<compile_context>
chip_gen: v5e
topology: v5e:2x2
jax: 0.10.0
libtpu: 0.0.40
codegen_flags: <defaults>
</compile_context>

<pallas_src>
import numpy as np
import jax
import jax.numpy as jnp
from jax.experimental import pallas as pl
from jax.experimental.pallas import tpu as pltpu

IMPOSSIBLE = -10000.0


def _crf_kernel(feat_ref, wT_ref, trans_ref, stop_ref,
                tag_ref, prev_ref, mask_ref,
                scal_ref, btag_ref, bps_ref,
                fwd_scr, vit_scr, gold_scr, ltag_scr):
    """One grid step = one time step for one batch tile.

    feat_ref : [D+1, Bb]  features (bias folded in), batch on lanes
    wT_ref   : [C, D+1]   transposed (augmented) fc weight
    trans_ref: [C, C]     transitions, trans[to, from]
    stop_ref : [C, 1]     trans[STOP, :] as a column
    tag_ref  : [1, Bb]    current tag
    prev_ref : [1, Bb]    previous tag (START at t=0)
    mask_ref : [1, Bb]    float mask
    scal_ref : [3, Bb]    output rows: forward score / gold score / best score
    btag_ref : [1, Bb]    output: Viterbi best last tag
    bps_ref  : [C, Bb]    output: back-pointers for this step (lane-dense)
    scratch  : fwd/vit [C, Bb] f32 carries, gold [1, Bb] f32, ltag [1, Bb] i32
    """
    C = wT_ref.shape[0]
    Bb = feat_ref.shape[1]
    START = C - 2

    t = pl.program_id(1)
    n_t = pl.num_programs(1)

    c_col = jax.lax.broadcasted_iota(jnp.int32, (C, Bb), 0)

    @pl.when(t == 0)
    def _init():
        init = jnp.where(c_col == START, 0.0, IMPOSSIBLE).astype(jnp.float32)
        fwd_scr[...] = init
        vit_scr[...] = init
        gold_scr[...] = jnp.zeros_like(gold_scr)
        ltag_scr[...] = jnp.full(ltag_scr.shape, START, dtype=jnp.int32)

    trans = trans_ref[...]                                   # [C, C]
    # ---- per-step emission, batch on lanes (MXU, output width = Bb) ----
    emit_t = jnp.dot(wT_ref[...], feat_ref[...],
                     preferred_element_type=jnp.float32)     # [C, Bb]

    mask_t = mask_ref[...]                                   # [1, Bb]
    keep_t = 1.0 - mask_t
    tags_t = tag_ref[...]                                    # [1, Bb]
    prev_t = prev_ref[...]                                   # [1, Bb]

    # ---- gold (numerator) score, accumulated over time ----
    oh_cur = (c_col == tags_t).astype(jnp.float32)           # [C, Bb]
    oh_prev = (c_col == prev_t).astype(jnp.float32)          # [C, Bb]
    emit_sc = jnp.sum(emit_t * oh_cur, axis=0, keepdims=True)            # [1, Bb]
    # trans[cur, prev] via MXU: (trans @ oh_prev)[i, b] = trans[i, prev_b]
    sel = jnp.dot(trans, oh_prev, preferred_element_type=jnp.float32)    # [C, Bb]
    trans_sc = jnp.sum(sel * oh_cur, axis=0, keepdims=True)              # [1, Bb]
    gold_scr[...] += (emit_sc + trans_sc) * mask_t
    ltag_scr[...] = jnp.where(mask_t > 0.0, tags_t, ltag_scr[...])

    # ---- forward-algorithm step (log-sum-exp over previous tag j) ----
    scores = fwd_scr[...]                                    # [C, Bb]  (j, b)
    st = scores[None, :, :] + trans[:, :, None] + emit_t[:, None, :]     # [Ci,Cj,Bb]
    m = jnp.max(st, axis=1)                                              # [C, Bb]
    lse = m + jnp.log(jnp.sum(jnp.exp(st - m[:, None, :]), axis=1))
    fwd_scr[...] = lse * mask_t + scores * keep_t

    # ---- Viterbi step (max / first-argmax over previous tag j) ----
    vs = vit_scr[...]                                        # [C, Bb]
    acc = vs[None, :, :] + trans[:, :, None]                 # [Ci, Cj, Bb]
    acc_max = jnp.max(acc, axis=1)                           # [C, Bb]
    j_iota = jax.lax.broadcasted_iota(jnp.int32, (C, C, Bb), 1)
    bp = jnp.min(jnp.where(acc == acc_max[:, None, :], j_iota, C),
                 axis=1).astype(jnp.int32)                   # [C, Bb]
    bps_ref[...] = bp
    vit_scr[...] = (acc_max + emit_t) * mask_t + vs * keep_t

    # ---- finalize on the last time step ----
    @pl.when(t == n_t - 1)
    def _finalize():
        stop_col = stop_ref[...]                             # [C, 1]

        fin = fwd_scr[...] + stop_col
        mf = jnp.max(fin, axis=0, keepdims=True)             # [1, Bb]
        fwd = mf + jnp.log(jnp.sum(jnp.exp(fin - mf), axis=0, keepdims=True))

        last_sc = jnp.sum(jnp.where(c_col == ltag_scr[...], stop_col, 0.0),
                          axis=0, keepdims=True)             # [1, Bb]
        gold = gold_scr[...] + last_sc

        vfin = vit_scr[...] + stop_col
        best = jnp.max(vfin, axis=0, keepdims=True)          # [1, Bb]
        btag = jnp.min(jnp.where(vfin == best, c_col, C),
                       axis=0, keepdims=True).astype(jnp.int32)

        scal_ref[...] = jnp.concatenate([fwd, gold, best], axis=0)   # [3, Bb]
        btag_ref[...] = btag                                          # [1, Bb]


def crf_pallas(params, features, ys, masks, *, b_blk=None):
    """Runs the Pallas CRF kernel.

    Returns (loss, forward_score, gold_score, best_score, best_tag, bps)
    where bps is [L, C, B] (time-major, batch on lanes).
    """
    W, b, trans = params["w"], params["b"], params["trans"]
    B, L, D = features.shape
    C = W.shape[1]
    start_idx, stop_idx = C - 2, C - 1

    # Fold the fc bias into the weight matrix via an appended all-ones feature.
    W_aug = jnp.concatenate([W.astype(jnp.float32),
                             b.reshape(1, C).astype(jnp.float32)], axis=0)  # [D+1, C]
    feats = jnp.concatenate([features.astype(jnp.float32),
                             jnp.ones((B, L, 1), jnp.float32)], axis=-1)    # [B, L, D+1]

    tags = ys.astype(jnp.int32)
    prev = jnp.concatenate(
        [jnp.full((B, 1), start_idx, jnp.int32), tags[:, :-1]], axis=1)
    masks_f = masks.astype(jnp.float32)

    # Batch tile (becomes the lane dimension inside the kernel).
    if b_blk is None:
        b_blk = B if B <= 128 else 128
    n_blk = -(-B // b_blk)
    Bp = n_blk * b_blk
    pad = Bp - B
    if pad:
        feats = jnp.pad(feats, ((0, pad), (0, 0), (0, 0)))
        tags = jnp.pad(tags, ((0, pad), (0, 0)))
        prev = jnp.pad(prev, ((0, pad), (0, 0)), constant_values=start_idx)
        masks_f = jnp.pad(masks_f, ((0, pad), (0, 0)))

    # Free layout plumbing in XLA: time-major, batch-on-lanes layouts.
    Dp1 = D + 1
    feats_dbt = jnp.transpose(feats, (1, 2, 0))          # [L, D+1, Bp]
    wT = W_aug.T                                         # [C, D+1]
    trans_f = trans.astype(jnp.float32)                  # [C, C]
    stop_col = trans_f[stop_idx, :].reshape(C, 1)        # [C, 1]
    tagsT = jnp.transpose(tags, (1, 0))[:, None, :]      # [L, 1, Bp]
    prevT = jnp.transpose(prev, (1, 0))[:, None, :]      # [L, 1, Bp]
    masksT = jnp.transpose(masks_f, (1, 0))[:, None, :]  # [L, 1, Bp]

    grid = (n_blk, L)

    # Explicit scoped-VMEM budget (per-step tiles + scratch, double-buffered, with
    # headroom for the [C, C, B_BLK] recurrence temporaries); clipped so it is safe
    # on v5e (16 MiB default) and v7x (64 MiB physical).
    per_blk = 4 * (Dp1 * b_blk + C * Dp1 + 2 * C * C + C
                   + 7 * b_blk + 3 * C * b_blk + 2 * C * C * b_blk)
    vmem_limit = int(min(max(4 * per_blk, 16 * 1024 * 1024), 48 * 1024 * 1024))

    scal, btag, bps = pl.pallas_call(
        _crf_kernel,
        out_shape=(
            jax.ShapeDtypeStruct((3, Bp), jnp.float32),   # [forward; gold; best_score]
            jax.ShapeDtypeStruct((1, Bp), jnp.int32),     # Viterbi best last tag
            jax.ShapeDtypeStruct((L, C, Bp), jnp.int32),  # back-pointers, lane-dense
        ),
        grid=grid,
        in_specs=[
            pl.BlockSpec((None, Dp1, b_blk), lambda i, t: (t, 0, i)),  # features
            pl.BlockSpec((C, Dp1), lambda i, t: (0, 0)),               # W^T (aug)
            pl.BlockSpec((C, C), lambda i, t: (0, 0)),                 # transitions
            pl.BlockSpec((C, 1), lambda i, t: (0, 0)),                 # stop column
            pl.BlockSpec((None, 1, b_blk), lambda i, t: (t, 0, i)),    # tags
            pl.BlockSpec((None, 1, b_blk), lambda i, t: (t, 0, i)),    # prev tags
            pl.BlockSpec((None, 1, b_blk), lambda i, t: (t, 0, i)),    # masks
        ],
        out_specs=(
            pl.BlockSpec((3, b_blk), lambda i, t: (0, i)),
            pl.BlockSpec((1, b_blk), lambda i, t: (0, i)),
            pl.BlockSpec((None, C, b_blk), lambda i, t: (t, 0, i)),
        ),
        scratch_shapes=[
            pltpu.VMEM((C, b_blk), jnp.float32),   # forward scores carry
            pltpu.VMEM((C, b_blk), jnp.float32),   # viterbi scores carry
            pltpu.VMEM((1, b_blk), jnp.float32),   # gold score accumulator
            pltpu.VMEM((1, b_blk), jnp.int32),     # last unmasked tag
        ],
        compiler_params=pltpu.CompilerParams(
            dimension_semantics=("parallel", "arbitrary"),
            vmem_limit_bytes=vmem_limit),
    )(feats_dbt, wT, trans_f, stop_col, tagsT, prevT, masksT)

    fwd = scal[0, :B]
    gold = scal[1, :B]
    best_score = scal[2, :B]
    best_tag = btag[0, :B]
    loss = jnp.mean(fwd - gold)
    return loss, fwd, gold, best_score, best_tag, bps[:, :, :B]


def viterbi_backtrack(bps, best_tag, masks):
    # TODO(synk): backtracking produces variable-length Python lists (as in the
    # PyTorch module) and is inherently sequential/data-dependent -> host-side numpy.
    bps = np.asarray(bps).transpose(2, 0, 1)   # [L, C, B] -> [B, L, C]
    best_tag = np.asarray(best_tag)
    masks = np.asarray(masks)
    best_paths = []
    for b in range(bps.shape[0]):
        bt = int(best_tag[b])
        seq_len = int(masks[b].sum())
        path = [bt]
        for bps_t in reversed(bps[b, :seq_len]):
            bt = int(bps_t[bt])
            path.append(bt)
        best_paths.append(path[-2::-1])
    return best_paths


def _reference(features, ys, masks, W, b, trans, start_idx, stop_idx):
    """Pure numpy re-implementation of the PyTorch CRF.forward for checking."""
    feats = features @ W + b
    B, L, C = feats.shape
    # forward algorithm
    scores = np.full((B, C), IMPOSSIBLE, np.float32)
    scores[:, start_idx] = 0.0
    for t in range(L):
        emit = feats[:, t][:, :, None]
        st = scores[:, None, :] + trans[None] + emit
        m = st.max(-1)
        lse = m + np.log(np.exp(st - m[..., None]).sum(-1))
        mt = masks[:, t][:, None]
        scores = lse * mt + scores * (1 - mt)
    fin = scores + trans[stop_idx][None]
    m = fin.max(-1)
    fwd = m + np.log(np.exp(fin - m[:, None]).sum(-1))
    # gold score
    emit_sc = np.take_along_axis(feats, ys[:, :, None].astype(np.int64), axis=2)[:, :, 0]
    tags_cat = np.concatenate(
        [np.full((B, 1), start_idx, np.int64), ys.astype(np.int64)], axis=1)
    trans_sc = trans[tags_cat[:, 1:], tags_cat[:, :-1]]
    last_tag = np.take_along_axis(tags_cat, masks.sum(1).astype(np.int64)[:, None], axis=1)[:, 0]
    gold = ((trans_sc + emit_sc) * masks).sum(1) + trans[stop_idx, last_tag]
    loss = (fwd - gold).mean()
    # viterbi
    ms = np.full((B, C), IMPOSSIBLE, np.float32)
    ms[:, start_idx] = 0.0
    bps = np.zeros((B, L, C), np.int64)
    for t in range(L):
        acc = ms[:, None, :] + trans[None]
        bps[:, t] = acc.argmax(-1)
        accm = acc.max(-1) + feats[:, t]
        mt = masks[:, t][:, None]
        ms = accm * mt + ms * (1 - mt)
    ms = ms + trans[stop_idx]
    best_score = ms.max(-1)
    best_tag = ms.argmax(-1)
    paths = []
    for bi in range(B):
        bt = int(best_tag[bi]); sl = int(masks[bi].sum()); path = [bt]
        for bps_t in reversed(bps[bi, :sl]):
            bt = int(bps_t[bt]); path.append(bt)
        paths.append(path[-2::-1])
    return loss, best_score, paths


if __name__ == "__main__":
    B, L, D, num_tags = 2, 8, 32, 6
    C = num_tags + 2
    start_idx, stop_idx = C - 2, C - 1

    key = jax.random.PRNGKey(0)
    kw, kb, kt, kf, ky = jax.random.split(key, 5)

    # Deterministic synthetic parameters (shapes from CRF.__init__).
    W = (jax.random.normal(kw, (D, C), jnp.float32) / np.sqrt(D)).astype(jnp.float32)
    bvec = (jax.random.normal(kb, (1, C), jnp.float32) * 0.1).astype(jnp.float32)
    trans = jax.random.normal(kt, (C, C), jnp.float32)
    trans = trans.at[start_idx, :].set(IMPOSSIBLE)
    trans = trans.at[:, stop_idx].set(IMPOSSIBLE)
    params = {"w": W, "b": bvec, "trans": trans}

    # Deterministic inputs.
    features = jax.random.normal(kf, (B, L, D), jnp.float32)
    ys = jax.random.randint(ky, (B, L), 0, num_tags).astype(jnp.int32)
    lengths = jnp.array([L, 5], dtype=jnp.int32)
    masks = (jnp.arange(L)[None, :] < lengths[:, None]).astype(jnp.float32)

    loss, fwd, gold, best_score, best_tag, bps = crf_pallas(params, features, ys, masks)
    jax.block_until_ready((loss, fwd, gold, best_score, best_tag, bps))
    best_paths = viterbi_backtrack(bps, best_tag, masks)

    # Correctness check against a plain numpy reference of the PyTorch module.
    ref_loss, ref_best_score, ref_paths = _reference(
        np.asarray(features), np.asarray(ys), np.asarray(masks),
        np.asarray(W), np.asarray(bvec), np.asarray(trans), start_idx, stop_idx)
    np.testing.assert_allclose(np.asarray(loss), ref_loss, rtol=1e-3, atol=1e-3)
    np.testing.assert_allclose(np.asarray(best_score), ref_best_score, rtol=1e-3, atol=1e-3)
    assert best_paths == ref_paths, (best_paths, ref_paths)

    print("KERNEL_OK")
</pallas_src>

<mosaic_0001>
module attributes {stable_mosaic.version = 11 : i64} {
  func.func @_crf_kernel(%arg0: i32, %arg1: i32, %arg2: memref<1x33x2xf32, #tpu.memory_space<vmem>>, %arg3: memref<8x33xf32, #tpu.memory_space<vmem>>, %arg4: memref<8x8xf32, #tpu.memory_space<vmem>>, %arg5: memref<8x1xf32, #tpu.memory_space<vmem>>, %arg6: memref<1x1x2xi32, #tpu.memory_space<vmem>>, %arg7: memref<1x1x2xi32, #tpu.memory_space<vmem>>, %arg8: memref<1x1x2xf32, #tpu.memory_space<vmem>>, %arg9: memref<3x2xf32, #tpu.memory_space<vmem>>, %arg10: memref<1x2xi32, #tpu.memory_space<vmem>>, %arg11: memref<1x8x2xi32, #tpu.memory_space<vmem>>, %arg12: memref<8x2xf32, #tpu.memory_space<vmem>>, %arg13: memref<8x2xf32, #tpu.memory_space<vmem>>, %arg14: memref<1x2xf32, #tpu.memory_space<vmem>>, %arg15: memref<1x2xi32, #tpu.memory_space<vmem>>) attributes {dimension_semantics = [#tpu.dimension_semantics<parallel>, #tpu.dimension_semantics<arbitrary>], iteration_bounds = array<i64: 1, 8>, scalar_prefetch = 0 : i64, scratch_operands = 4 : i64, tpu.core_type = #tpu.core_type<tc>, window_params = [{transform_indices = @transform_0, window_bounds = array<i64: 1, 33, 2>}, {pipeline_mode = #tpu.pipeline_mode<synchronous>, transform_indices = @transform_1, window_bounds = array<i64: 8, 33>}, {pipeline_mode = #tpu.pipeline_mode<synchronous>, transform_indices = @transform_2, window_bounds = array<i64: 8, 8>}, {pipeline_mode = #tpu.pipeline_mode<synchronous>, transform_indices = @transform_3, window_bounds = array<i64: 8, 1>}, {transform_indices = @transform_4, window_bounds = array<i64: 1, 1, 2>}, {transform_indices = @transform_5, window_bounds = array<i64: 1, 1, 2>}, {transform_indices = @transform_6, window_bounds = array<i64: 1, 1, 2>}, {transform_indices = @transform_7, window_bounds = array<i64: 3, 2>}, {transform_indices = @transform_8, window_bounds = array<i64: 1, 2>}, {transform_indices = @transform_9, window_bounds = array<i64: 1, 8, 2>}]} {
    %0 = tpu.iota {dimensions = array<i32: 0>} : vector<8x2xi32>
    %c0_i32 = arith.constant 0 : i32
    %1 = arith.cmpi eq, %arg1, %c0_i32 : i32
    %2 = arith.extui %1 : i1 to i32
    %c0_i32_0 = arith.constant 0 : i32
    %3 = arith.cmpi ne, %2, %c0_i32_0 : i32
    scf.if %3 {
      %c6_i32 = arith.constant 6 : i32
      %92 = vector.broadcast %c6_i32 : i32 to vector<8x2xi32>
      %93 = arith.cmpi eq, %0, %92 : vector<8x2xi32>
      %cst_45 = arith.constant 0.000000e+00 : f32
      %cst_46 = arith.constant -1.000000e+04 : f32
      %94 = vector.broadcast %cst_45 : f32 to vector<8x2xf32>
      %95 = vector.broadcast %cst_46 : f32 to vector<8x2xf32>
      %96 = arith.select %93, %94, %95 : vector<8x2xi1>, vector<8x2xf32>
      %c0_47 = arith.constant 0 : index
      %c0_48 = arith.constant 0 : index
      %97 = vector.load %arg12[%c0_47, %c0_48] : memref<8x2xf32, #tpu.memory_space<vmem>>, vector<8x2xf32>
      tpu.vector_store %arg12[%c0_47, %c0_48], %96 {strides = array<i32>} : memref<8x2xf32, #tpu.memory_space<vmem>>, vector<8x2xf32>,
      %c0_49 = arith.constant 0 : index
      %c0_50 = arith.constant 0 : index
      %98 = vector.load %arg13[%c0_49, %c0_50] : memref<8x2xf32, #tpu.memory_space<vmem>>, vector<8x2xf32>
      tpu.vector_store %arg13[%c0_49, %c0_50], %96 {strides = array<i32>} : memref<8x2xf32, #tpu.memory_space<vmem>>, vector<8x2xf32>,
      %cst_51 = arith.constant 0.000000e+00 : f32
      %99 = vector.broadcast %cst_51 : f32 to vector<1x2xf32>
      %c0_52 = arith.constant 0 : index
      %c0_53 = arith.constant 0 : index
      %100 = vector.load %arg14[%c0_52, %c0_53] : memref<1x2xf32, #tpu.memory_space<vmem>>, vector<1x2xf32>
      tpu.vector_store %arg14[%c0_52, %c0_53], %99 {strides = array<i32>} : memref<1x2xf32, #tpu.memory_space<vmem>>, vector<1x2xf32>,
      %c6_i32_54 = arith.constant 6 : i32
      %101 = vector.broadcast %c6_i32_54 : i32 to vector<1x2xi32>
      %c0_55 = arith.constant 0 : index
      %c0_56 = arith.constant 0 : index
      %102 = vector.load %arg15[%c0_55, %c0_56] : memref<1x2xi32, #tpu.memory_space<vmem>>, vector<1x2xi32>
      tpu.vector_store %arg15[%c0_55, %c0_56], %101 {strides = array<i32>} : memref<1x2xi32, #tpu.memory_space<vmem>>, vector<1x2xi32>,
    } else {
    }
    %c0 = arith.constant 0 : index
    %c0_1 = arith.constant 0 : index
    %4 = vector.load %arg4[%c0, %c0_1] : memref<8x8xf32, #tpu.memory_space<vmem>>, vector<8x8xf32>
    %c0_2 = arith.constant 0 : index
    %c0_3 = arith.constant 0 : index
    %5 = vector.load %arg3[%c0_2, %c0_3] : memref<8x33xf32, #tpu.memory_space<vmem>>, vector<8x33xf32>
    %c0_4 = arith.constant 0 : index
    %c0_5 = arith.constant 0 : index
    %c0_6 = arith.constant 0 : index
    %6 = vector.load %arg2[%c0_4, %c0_5, %c0_6] : memref<1x33x2xf32, #tpu.memory_space<vmem>>, vector<1x33x2xf32>
    %7 = vector.shape_cast %6 : vector<1x33x2xf32> to vector<33x2xf32>
    %cst = arith.constant dense<0.000000e+00> : vector<8x2xf32>
    %8 = tpu.matmul %5, %7, %cst {dimension_numbers = #tpu.dot_dimension_numbers<[1], [0], [0], [1], [0, 0, 1, 1], [], []>} : vector<8x33xf32>, vector<33x2xf32>, vector<8x2xf32> -> vector<8x2xf32>
    %c0_7 = arith.constant 0 : index
    %c0_8 = arith.constant 0 : index
    %c0_9 = arith.constant 0 : index
    %9 = vector.load %arg8[%c0_7, %c0_8, %c0_9] : memref<1x1x2xf32, #tpu.memory_space<vmem>>, vector<1x1x2xf32>
    %10 = vector.shape_cast %9 : vector<1x1x2xf32> to vector<1x2xf32>
    %cst_10 = arith.constant 1.000000e+00 : f32
    %11 = vector.broadcast %cst_10 : f32 to vector<1x2xf32>
    %12 = arith.subf %11, %10 : vector<1x2xf32>
    %c0_11 = arith.constant 0 : index
    %c0_12 = arith.constant 0 : index
    %c0_13 = arith.constant 0 : index
    %13 = vector.load %arg6[%c0_11, %c0_12, %c0_13] : memref<1x1x2xi32, #tpu.memory_space<vmem>>, vector<1x1x2xi32>
    %14 = vector.shape_cast %13 : vector<1x1x2xi32> to vector<1x2xi32>
    %c0_14 = arith.constant 0 : index
    %c0_15 = arith.constant 0 : index
    %c0_16 = arith.constant 0 : index
    %15 = vector.load %arg7[%c0_14, %c0_15, %c0_16] : memref<1x1x2xi32, #tpu.memory_space<vmem>>, vector<1x1x2xi32>
    %16 = vector.shape_cast %15 : vector<1x1x2xi32> to vector<1x2xi32>
    %17 = vector.broadcast %14 : vector<1x2xi32> to vector<8x2xi32>
    %18 = arith.cmpi eq, %0, %17 : vector<8x2xi32>
    %19 = arith.extui %18 : vector<8x2xi1> to vector<8x2xi32>
    %20 = arith.sitofp %19 : vector<8x2xi32> to vector<8x2xf32>
    %21 = vector.broadcast %16 : vector<1x2xi32> to vector<8x2xi32>
    %22 = arith.cmpi eq, %0, %21 : vector<8x2xi32>
    %23 = arith.extui %22 : vector<8x2xi1> to vector<8x2xi32>
    %24 = arith.sitofp %23 : vector<8x2xi32> to vector<8x2xf32>
    %25 = arith.mulf %8, %20 : vector<8x2xf32>
    %cst_17 = arith.constant dense<0.000000e+00> : vector<2xf32>
    %26 = vector.multi_reduction <add>, %25, %cst_17 [0] : vector<8x2xf32> to vector<2xf32>
    %27 = vector.shape_cast %26 : vector<2xf32> to vector<1x2xf32>
    %cst_18 = arith.constant dense<0.000000e+00> : vector<8x2xf32>
    %28 = tpu.matmul %4, %24, %cst_18 {dimension_numbers = #tpu.dot_dimension_numbers<[1], [0], [0], [1], [0, 0, 1, 1], [], []>} : vector<8x8xf32>, vector<8x2xf32>, vector<8x2xf32> -> vector<8x2xf32>
    %29 = arith.mulf %28, %20 : vector<8x2xf32>
    %cst_19 = arith.constant dense<0.000000e+00> : vector<2xf32>
    %30 = vector.multi_reduction <add>, %29, %cst_19 [0] : vector<8x2xf32> to vector<2xf32>
    %31 = vector.shape_cast %30 : vector<2xf32> to vector<1x2xf32>
    %c0_20 = arith.constant 0 : index
    %c0_21 = arith.constant 0 : index
    %32 = vector.load %arg14[%c0_20, %c0_21] : memref<1x2xf32, #tpu.memory_space<vmem>>, vector<1x2xf32>
    %33 = arith.addf %27, %31 : vector<1x2xf32>
    %34 = arith.mulf %33, %10 : vector<1x2xf32>
    %35 = arith.addf %32, %34 : vector<1x2xf32>
    %c0_22 = arith.constant 0 : index
    %c0_23 = arith.constant 0 : index
    %36 = vector.load %arg14[%c0_22, %c0_23] : memref<1x2xf32, #tpu.memory_space<vmem>>, vector<1x2xf32>
    tpu.vector_store %arg14[%c0_22, %c0_23], %35 {strides = array<i32>} : memref<1x2xf32, #tpu.memory_space<vmem>>, vector<1x2xf32>,
    %cst_24 = arith.constant 0.000000e+00 : f32
    %37 = vector.broadcast %cst_24 : f32 to vector<1x2xf32>
    %38 = arith.cmpf ogt, %10, %37 : vector<1x2xf32>
    %c0_25 = arith.constant 0 : index
    %c0_26 = arith.constant 0 : index
    %39 = vector.load %arg15[%c0_25, %c0_26] : memref<1x2xi32, #tpu.memory_space<vmem>>, vector<1x2xi32>
    %40 = arith.select %38, %14, %39 : vector<1x2xi1>, vector<1x2xi32>
    %c0_27 = arith.constant 0 : index
    %c0_28 = arith.constant 0 : index
    %41 = vector.load %arg15[%c0_27, %c0_28] : memref<1x2xi32, #tpu.memory_space<vmem>>, vector<1x2xi32>
    tpu.vector_store %arg15[%c0_27, %c0_28], %40 {strides = array<i32>} : memref<1x2xi32, #tpu.memory_space<vmem>>, vector<1x2xi32>,
    %c0_29 = arith.constant 0 : index
    %c0_30 = arith.constant 0 : index
    %42 = vector.load %arg12[%c0_29, %c0_30] : memref<8x2xf32, #tpu.memory_space<vmem>>, vector<8x2xf32>
    %43 = vector.shape_cast %42 : vector<8x2xf32> to vector<1x8x2xf32>
    %44 = vector.shape_cast %4 : vector<8x8xf32> to vector<8x8x1xf32>
    %45 = vector.broadcast %43 : vector<1x8x2xf32> to vector<8x8x2xf32>
    %46 = vector.broadcast %44 : vector<8x8x1xf32> to vector<8x8x2xf32>
    %47 = arith.addf %45, %46 : vector<8x8x2xf32>
    %48 = vector.shape_cast %8 : vector<8x2xf32> to vector<8x1x2xf32>
    %49 = vector.broadcast %48 : vector<8x1x2xf32> to vector<8x8x2xf32>
    %50 = arith.addf %47, %49 : vector<8x8x2xf32>
    %cst_31 = arith.constant dense<0xFF800000> : vector<8x2xf32>
    %51 = vector.multi_reduction <maximumf>, %50, %cst_31 [1] : vector<8x8x2xf32> to vector<8x2xf32>
    %52 = vector.shape_cast %51 : vector<8x2xf32> to vector<8x1x2xf32>
    %53 = vector.broadcast %52 : vector<8x1x2xf32> to vector<8x8x2xf32>
    %54 = arith.subf %50, %53 : vector<8x8x2xf32>
    %55 = math.exp %54 : vector<8x8x2xf32>
    %cst_32 = arith.constant dense<0.000000e+00> : vector<8x2xf32>
    %56 = vector.multi_reduction <add>, %55, %cst_32 [1] : vector<8x8x2xf32> to vector<8x2xf32>
    %57 = math.log %56 : vector<8x2xf32>
    %58 = arith.addf %51, %57 : vector<8x2xf32>
    %59 = vector.broadcast %10 : vector<1x2xf32> to vector<8x2xf32>
    %60 = arith.mulf %58, %59 : vector<8x2xf32>
    %61 = vector.broadcast %12 : vector<1x2xf32> to vector<8x2xf32>
    %62 = arith.mulf %42, %61 : vector<8x2xf32>
    %63 = arith.addf %60, %62 : vector<8x2xf32>
    %c0_33 = arith.constant 0 : index
    %c0_34 = arith.constant 0 : index
    %64 = vector.load %arg12[%c0_33, %c0_34] : memref<8x2xf32, #tpu.memory_space<vmem>>, vector<8x2xf32>
    tpu.vector_store %arg12[%c0_33, %c0_34], %63 {strides = array<i32>} : memref<8x2xf32, #tpu.memory_space<vmem>>, vector<8x2xf32>,
    %c0_35 = arith.constant 0 : index
    %c0_36 = arith.constant 0 : index
    %65 = vector.load %arg13[%c0_35, %c0_36] : memref<8x2xf32, #tpu.memory_space<vmem>>, vector<8x2xf32>
    %66 = vector.shape_cast %65 : vector<8x2xf32> to vector<1x8x2xf32>
    %67 = vector.shape_cast %4 : vector<8x8xf32> to vector<8x8x1xf32>
    %68 = vector.broadcast %66 : vector<1x8x2xf32> to vector<8x8x2xf32>
    %69 = vector.broadcast %67 : vector<8x8x1xf32> to vector<8x8x2xf32>
    %70 = arith.addf %68, %69 : vector<8x8x2xf32>
    %cst_37 = arith.constant dense<0xFF800000> : vector<8x2xf32>
    %71 = vector.multi_reduction <maximumf>, %70, %cst_37 [1] : vector<8x8x2xf32> to vector<8x2xf32>
    %72 = tpu.iota {dimensions = array<i32: 1>} : vector<8x8x2xi32>
    %73 = vector.shape_cast %71 : vector<8x2xf32> to vector<8x1x2xf32>
    %74 = vector.broadcast %73 : vector<8x1x2xf32> to vector<8x8x2xf32>
    %75 = arith.cmpf oeq, %70, %74 : vector<8x8x2xf32>
    %c8_i32 = arith.constant 8 : i32
    %76 = vector.broadcast %c8_i32 : i32 to vector<8x8x2xi32>
    %77 = arith.select %75, %72, %76 : vector<8x8x2xi1>, vector<8x8x2xi32>
    %cst_38 = arith.constant dense<2147483647> : vector<8x2xi32>
    %78 = vector.multi_reduction <minsi>, %77, %cst_38 [1] : vector<8x8x2xi32> to vector<8x2xi32>
    %c0_39 = arith.constant 0 : index
    %c0_40 = arith.constant 0 : index
    %c0_41 = arith.constant 0 : index
    %79 = vector.load %arg11[%c0_39, %c0_40, %c0_41] : memref<1x8x2xi32, #tpu.memory_space<vmem>>, vector<1x8x2xi32>
    %80 = vector.shape_cast %79 : vector<1x8x2xi32> to vector<8x2xi32>
    %81 = vector.shape_cast %78 : vector<8x2xi32> to vector<1x8x2xi32>
    tpu.vector_store %arg11[%c0_39, %c0_40, %c0_41], %81 {strides = array<i32>} : memref<1x8x2xi32, #tpu.memory_space<vmem>>, vector<1x8x2xi32>,
    %82 = arith.addf %71, %8 : vector<8x2xf32>
    %83 = vector.broadcast %10 : vector<1x2xf32> to vector<8x2xf32>
    %84 = arith.mulf %82, %83 : vector<8x2xf32>
    %85 = vector.broadcast %12 : vector<1x2xf32> to vector<8x2xf32>
    %86 = arith.mulf %65, %85 : vector<8x2xf32>
    %87 = arith.addf %84, %86 : vector<8x2xf32>
    %c0_42 = arith.constant 0 : index
    %c0_43 = arith.constant 0 : index
    %88 = vector.load %arg13[%c0_42, %c0_43] : memref<8x2xf32, #tpu.memory_space<vmem>>, vector<8x2xf32>
    tpu.vector_store %arg13[%c0_42, %c0_43], %87 {strides = array<i32>} : memref<8x2xf32, #tpu.memory_space<vmem>>, vector<8x2xf32>,
    %c7_i32 = arith.constant 7 : i32
    %89 = arith.cmpi eq, %arg1, %c7_i32 : i32
    %90 = arith.extui %89 : i1 to i32
    %c0_i32_44 = arith.constant 0 : i32
    %91 = arith.cmpi ne, %90, %c0_i32_44 : i32
    scf.if %91 {
      %c0_45 = arith.constant 0 : index
      %c0_46 = arith.constant 0 : index
      %92 = vector.load %arg5[%c0_45, %c0_46] : memref<8x1xf32, #tpu.memory_space<vmem>>, vector<8x1xf32>
      %c0_47 = arith.constant 0 : index
      %c0_48 = arith.constant 0 : index
      %93 = vector.load %arg12[%c0_47, %c0_48] : memref<8x2xf32, #tpu.memory_space<vmem>>, vector<8x2xf32>
      %94 = vector.broadcast %92 : vector<8x1xf32> to vector<8x2xf32>
      %95 = arith.addf %93, %94 : vector<8x2xf32>
      %cst_49 = arith.constant dense<0xFF800000> : vector<2xf32>
      %96 = vector.multi_reduction <maximumf>, %95, %cst_49 [0] : vector<8x2xf32> to vector<2xf32>
      %97 = vector.shape_cast %96 : vector<2xf32> to vector<1x2xf32>
      %98 = vector.broadcast %97 : vector<1x2xf32> to vector<8x2xf32>
      %99 = arith.subf %95, %98 : vector<8x2xf32>
      %100 = math.exp %99 : vector<8x2xf32>
      %cst_50 = arith.constant dense<0.000000e+00> : vector<2xf32>
      %101 = vector.multi_reduction <add>, %100, %cst_50 [0] : vector<8x2xf32> to vector<2xf32>
      %102 = vector.shape_cast %101 : vector<2xf32> to vector<1x2xf32>
      %103 = math.log %102 : vector<1x2xf32>
      %104 = arith.addf %97, %103 : vector<1x2xf32>
      %c0_51 = arith.constant 0 : index
      %c0_52 = arith.constant 0 : index
      %105 = vector.load %arg15[%c0_51, %c0_52] : memref<1x2xi32, #tpu.memory_space<vmem>>, vector<1x2xi32>
      %106 = vector.broadcast %105 : vector<1x2xi32> to vector<8x2xi32>
      %107 = arith.cmpi eq, %0, %106 : vector<8x2xi32>
      %cst_53 = arith.constant 0.000000e+00 : f32
      %108 = vector.shape_cast %92 : vector<8x1xf32> to vector<8x1xf32>
      %109 = vector.broadcast %108 : vector<8x1xf32> to vector<8x2xf32>
      %110 = vector.broadcast %cst_53 : f32 to vector<8x2xf32>
      %111 = arith.select %107, %109, %110 : vector<8x2xi1>, vector<8x2xf32>
      %cst_54 = arith.constant dense<0.000000e+00> : vector<2xf32>
      %112 = vector.multi_reduction <add>, %111, %cst_54 [0] : vector<8x2xf32> to vector<2xf32>
      %113 = vector.shape_cast %112 : vector<2xf32> to vector<1x2xf32>
      %c0_55 = arith.constant 0 : index
      %c0_56 = arith.constant 0 : index
      %114 = vector.load %arg14[%c0_55, %c0_56] : memref<1x2xf32, #tpu.memory_space<vmem>>, vector<1x2xf32>
      %115 = arith.addf %114, %113 : vector<1x2xf32>
      %c0_57 = arith.constant 0 : index
      %c0_58 = arith.constant 0 : index
      %116 = vector.load %arg13[%c0_57, %c0_58] : memref<8x2xf32, #tpu.memory_space<vmem>>, vector<8x2xf32>
      %117 = vector.broadcast %92 : vector<8x1xf32> to vector<8x2xf32>
      %118 = arith.addf %116, %117 : vector<8x2xf32>
      %cst_59 = arith.constant dense<0xFF800000> : vector<2xf32>
      %119 = vector.multi_reduction <maximumf>, %118, %cst_59 [0] : vector<8x2xf32> to vector<2xf32>
      %120 = vector.shape_cast %119 : vector<2xf32> to vector<1x2xf32>
      %121 = vector.broadcast %120 : vector<1x2xf32> to vector<8x2xf32>
      %122 = arith.cmpf oeq, %118, %121 : vector<8x2xf32>
      %c8_i32_60 = arith.constant 8 : i32
      %123 = vector.broadcast %c8_i32_60 : i32 to vector<8x2xi32>
      %124 = arith.select %122, %0, %123 : vector<8x2xi1>, vector<8x2xi32>
      %cst_61 = arith.constant dense<2147483647> : vector<2xi32>
      %125 = vector.multi_reduction <minsi>, %124, %cst_61 [0] : vector<8x2xi32> to vector<2xi32>
      %126 = vector.shape_cast %125 : vector<2xi32> to vector<1x2xi32>
      %127 = tpu.concatenate %104, %115, %120 in 0 : vector<1x2xf32>, vector<1x2xf32>, vector<1x2xf32> -> vector<3x2xf32>
      %c0_62 = arith.constant 0 : index
      %c0_63 = arith.constant 0 : index
      %128 = vector.load %arg9[%c0_62, %c0_63] : memref<3x2xf32, #tpu.memory_space<vmem>>, vector<3x2xf32>
      tpu.vector_store %arg9[%c0_62, %c0_63], %127 {strides = array<i32>} : memref<3x2xf32, #tpu.memory_space<vmem>>, vector<3x2xf32>,
      %c0_64 = arith.constant 0 : index
      %c0_65 = arith.constant 0 : index
      %129 = vector.load %arg10[%c0_64, %c0_65] : memref<1x2xi32, #tpu.memory_space<vmem>>, vector<1x2xi32>
      tpu.vector_store %arg10[%c0_64, %c0_65], %126 {strides = array<i32>} : memref<1x2xi32, #tpu.memory_space<vmem>>, vector<1x2xi32>,
    } else {
    }
    return
  }
  func.func @transform_0(%arg0: i32, %arg1: i32) -> (i32, i32, i32) {
    %c0_i32 = arith.constant 0 : i32
    %c0_i32_0 = arith.constant 0 : i32
    return %arg1, %c0_i32, %arg0 : i32, i32, i32
  }
  func.func @transform_1(%arg0: i32, %arg1: i32) -> (i32, i32) {
    %c0_i32 = arith.constant 0 : i32
    %c0_i32_0 = arith.constant 0 : i32
    %c0_i32_1 = arith.constant 0 : i32
    return %c0_i32, %c0_i32_0 : i32, i32
  }
  func.func @transform_2(%arg0: i32, %arg1: i32) -> (i32, i32) {
    %c0_i32 = arith.constant 0 : i32
    %c0_i32_0 = arith.constant 0 : i32
    %c0_i32_1 = arith.constant 0 : i32
    return %c0_i32, %c0_i32_0 : i32, i32
  }
  func.func @transform_3(%arg0: i32, %arg1: i32) -> (i32, i32) {
    %c0_i32 = arith.constant 0 : i32
    %c0_i32_0 = arith.constant 0 : i32
    %c0_i32_1 = arith.constant 0 : i32
    return %c0_i32, %c0_i32_0 : i32, i32
  }
  func.func @transform_4(%arg0: i32, %arg1: i32) -> (i32, i32, i32) {
    %c0_i32 = arith.constant 0 : i32
    %c0_i32_0 = arith.constant 0 : i32
    return %arg1, %c0_i32, %arg0 : i32, i32, i32
  }
  func.func @transform_5(%arg0: i32, %arg1: i32) -> (i32, i32, i32) {
    %c0_i32 = arith.constant 0 : i32
    %c0_i32_0 = arith.constant 0 : i32
    return %arg1, %c0_i32, %arg0 : i32, i32, i32
  }
  func.func @transform_6(%arg0: i32, %arg1: i32) -> (i32, i32, i32) {
    %c0_i32 = arith.constant 0 : i32
    %c0_i32_0 = arith.constant 0 : i32
    return %arg1, %c0_i32, %arg0 : i32, i32, i32
  }
  func.func @transform_7(%arg0: i32, %arg1: i32) -> (i32, i32) {
    %c0_i32 = arith.constant 0 : i32
    %c0_i32_0 = arith.constant 0 : i32
    return %c0_i32, %arg0 : i32, i32
  }
  func.func @transform_8(%arg0: i32, %arg1: i32) -> (i32, i32) {
    %c0_i32 = arith.constant 0 : i32
    %c0_i32_0 = arith.constant 0 : i32
    return %c0_i32, %arg0 : i32, i32
  }
  func.func @transform_9(%arg0: i32, %arg1: i32) -> (i32, i32, i32) {
    %c0_i32 = arith.constant 0 : i32
    %c0_i32_0 = arith.constant 0 : i32
    return %arg1, %c0_i32, %arg0 : i32, i32, i32
  }
}

</mosaic_0001>

<bundles_post_ra>
// kernel: tpu_custom_call.1
= control target key start
LH: loop header
LB: loop body
LE: loop exit
PB: predicated region body
PF: predicated region fallthrough
CT: control target
= control target key end

     0   :  { %15 = vsyncpa [#allocation7], 0  ;;  %s1591_s30 = smov 0   ;;  %s1593_s10 = smov 0   ;;  %s2096_s0 = inlined_call_operand.vmem [shape: f32[8,33,2], index: 0, kind: input, shape index: {}]   ;;  %s2097_s1 = inlined_call_operand.vmem [shape: f32[8,33], index: 1, kind: input, shape index: {}]   ;;  %s2098_s2 = inlined_call_operand.vmem [shape: f32[8,8], index: 2, kind: input, shape index: {}]   ;;  %s2099_s3 = inlined_call_operand.vmem [shape: f32[8,1], index: 3, kind: input, shape index: {}]   ;;  %s2100_s4 = inlined_call_operand.vmem [shape: s32[8,1,2], index: 4, kind: input, shape index: {}]   ;;  %s2101_s5 = inlined_call_operand.vmem [shape: s32[8,1,2], index: 5, kind: input, shape index: {}]   ;;  %s2102_s6 = inlined_call_operand.vmem [shape: f32[8,1,2], index: 6, kind: input, shape index: {}]   ;;  %s2103_s7 = inlined_call_operand.vmem [shape: f32[3,2], index: 7, kind: output, shape index: {0}]   ;;  %s2104_s8 = inlined_call_operand.hbm [shape: s32[1,2], index: 8, kind: output, shape index: {1}]   ;;  %s2105_s9 = inlined_call_operand.vmem [shape: s32[8,8,2], index: 9, kind: output, shape index: {2}]  }
   0x1   :  { %s1595_s11 = smov 0  }
   0x2 LB: > { %s30_s13 = sadd.s32 1, %s1528_s10  ;;  %p1381_p1 = scmp.ge.s32.totalorder %s1532_s11, 1  ;;  %s1532_s11 = sphi %s1595_s11, %s21_s11   ;;  %s1528_s10 = sphi %s1593_s10, %s2124_s10   ;;  %s1524_s30 = sphi %s1591_s30, %s2123_s30  }
   0x3   : > { %p31_p0 = scmp.ge.s32.totalorder %s30_s13, 8  ;;  %p351_p2 = scmp.lt.s32.totalorder %s1532_s11, 9 }
   0x5   : > { %s2126_s13 = smov (%p31_p0, %s30_s13), 0  ;;  %p352_p3 = pnand %p1381_p1, %p351_p2 }
   0x6   : > { %p414_p4 = scmp.lt.s32.totalorder (!%p352_p3), %s1524_s30, 7  ;;  %p1384_p5 = scmp.ne.s32.totalorder (!%p352_p3), %s1524_s30, 0 }
   0x7   : > { %355 = sbr.rel (%p352_p3) target bundleno = 461 (0x1cd), region = 48 }
   0xc   : > { %v451_v0 = vlaneseq  ;;  %s1614_s14 = scalar_select %p414_p4, %s1524_s30, 7 }
   0xd   : > { %456 = sbr.rel (%p1384_p5) target bundleno = 24 (0x18), region = 52 }
   0xe   : > { %v1616_v1 = vshrl.u32 %v451_v0, 7  ;;  %s1397_s15 = smul.u32 40, %s1614_s14  ;;  %s1623_s18 = scalar_lea.vmem %s2100_s4, %s1614_s14 }
   0xf   : > { %s433_s21 = scalar_lea.vmem %s2101_s5, %s1614_s14  ;;  %s439_s24 = scalar_lea.vmem %s2102_s6, %s1614_s14 }
  0x10   : > { %s1636_s27 = scalar_lea.vmem %s2096_s0, %s1397_s15  ;;  %s1383_s28 = sshll.u32 %s1614_s14, 3 }
  0x11   : > { %s1642_s16 = scalar_lea.vmem %s2105_s9, %s1383_s28 }
  0x12   : > { %vm457_vm0 = vcmp.eq.s32.totalorder %v1616_v1, 6  ;;  %vm459_vm1 = vcmask 15360   ;;  %v1534_v2 = vmov -10000.0   ;;  %vm462_vm2 = vcmask 8192  }
  0x13   : > { %v458_v3 = vsel %vm457_vm0, 0.0, %v1534_v2  ;;  %v1535_v4 = vmov 0.0   ;;  %v1536_v5 = vmov 6  }
  0x14   : > { %460 = vst.msk [vmem:[#allocation2] sm:$0xff] %vm459_vm1, %v458_v3 }
  0x15   : > { %461 = vst.msk [vmem:[#allocation3] sm:$0xff] %vm459_vm1, %v458_v3 }
  0x16   : > { %463 = vst.msk [vmem:[#allocation4] sm:$0x1] %vm462_vm2, %v1535_v4 }
  0x17   : > { %464 = vst.msk [vmem:[#allocation5] sm:$0x1] %vm462_vm2, %v1536_v5 }
  0x18 PF: > { %1436 = vset.pattern.permute.xlu1 %v1616_v1  ;;  %1435 = vset.pattern.permute.xlu0 %v1616_v1  ;;  %v471_v6 = vld [vmem:[%s1636_s27 + $0x20] sm:$0x1]  ;;  %vm476_vm3 = vcmask 1040384   ;;  %v470_v7 = vld [vmem:[%s1636_s27 + $0x18] sm:$0xff]  ;;  %v469_v9 = vld [vmem:[%s1636_s27 + $0x10] sm:$0xff]  ;;  %vm521_vm4 = vcmask 64512  }
  0x19   : > { %1385 = vmatpush.msk.msra.mxu0 %vm476_vm3, %v471_v6  ;;  %1437 = vset.pattern.permute.xlu2 %v1616_v1  ;;  %v465_v8 = vld [vmem:[%s2098_s2] sm:$0xff]  ;;  %v468_v11 = vld [vmem:[%s1636_s27 + $0x8] sm:$0xff]  ;;  %v1537_v14 = vmov 1.0   ;;  %vm472_vm6 = vcmask 269312   ;;  %vm513_vm7 = vcmask 15360   ;;  %p1391_p6 = scmp.ne.s32.totalorder %s1524_s30, 7 }
  0x1a   : > { %v1438_v10 = vld [vmem:[%s433_s21] ss:$0 sm:$0xff]  ;;  %v571_v12 = vperm.slane %v465_v8, 1  ;;  %v564_v13 = vperm.slane %v465_v8, 0  ;;  %v592_v15 = vperm.slane %v465_v8, 4  ;;  %v578_v18 = vperm.slane %v465_v8, 2 }
  0x1b   : > { %492 = vmatpush.msra.mxu0 %v470_v7  ;;  %vm509_vm5 = vcmp.eq.s32.totalorder %v1616_v1, %v1438_v10  ;;  %v467_v16 = vld [vmem:[%s1636_s27] sm:$0xff]  ;;  %v585_v19 = vperm.slane %v465_v8, 3  ;;  %v599_v20 = vperm.slane %v465_v8, 5  ;;  %v606_v21 = vperm.slane %v465_v8, 6 }
  0x1c   : > { %1389 = vmatpush.msk.msra.mxu1 %vm509_vm5, %v1537_v14  ;;  %v466_v17 = vld [vmem:[%s2097_s1] sm:$0xff]  ;;  %v613_v22 = vperm.slane %v465_v8, 7  ;;  %v1664_v24 = vld [vmem:[#allocation3] sm:$0xff] }
  0x1d   : > { %493 = vmatpush.msra.mxu0 %v469_v9  ;;  %1390 = vmatmul.msk.f32.vlgmr.msra.gmra.mxu1 %vm521_vm4, %v465_v8  ;;  %v1703_v61 = vld [vmem:[#allocation2] sm:$0xff]  ;;  %vm557_vm4 = vcmask 8192  }
  0x1f   : > { %494 = vmatpush.msra.mxu0 %v468_v11 }
  0x20   : > { %576 = vperm.xlu0 %1435, %v571_v12   ;;  %569 = vperm.xlu1 %1436, %v564_v13  }
  0x21   : > { %495 = vmatpush.msra.mxu0 %v467_v16  ;;  %597 = vperm.xlu2 %1437, %v592_v15  }
  0x22   : > { %1386 = vmatmul.msk.f32.vlgmr.msra.gmra.mxu0 %vm472_vm6, %v466_v17 }
  0x28   : > { %583 = vperm.xlu0 %1435, %v578_v18   ;;  %590 = vperm.xlu1 %1436, %v585_v19  }
  0x29   : > { %604 = vperm.xlu2 %1437, %v599_v20  }
  0x30   : > { %611 = vperm.xlu0 %1435, %v606_v21   ;;  %618 = vperm.xlu1 %1436, %v613_v22  }
  0x7b   : > { %v1662_v23 = vpop.permute.xlu2 %597 }
  0x7c   : > { %v1674_v29 = vadd.f32 %v1664_v24, %v1662_v23 }
  0x7e   : > { %v927_v35 = vsel %vm513_vm7, %v1674_v29, -inf }
  0x7f   : > { %v928_v42 = vrot.slane %v927_v35, 4 }
  0x81   : > { %v929_v50 = vmax.f32 %v927_v35, %v928_v42 }
  0x83   : > { %v1678_v31 = vpop.permute.xlu2 %604  ;;  %v930_v59 = vrot.slane %v929_v50, 2 }
  0x84   : > { %v1686_v36 = vadd.f32 %v1664_v24, %v1678_v31 }
  0x85   : > { %v931_v7 = vmax.f32 %v929_v50, %v930_v59 }
  0x86   : > { %v934_v44 = vsel %vm513_vm7, %v1686_v36, -inf }
  0x87   : > { %v935_v51 = vrot.slane %v934_v44, 4  ;;  %v932_v20 = vrot.slane %v931_v7, 1 }
  0x89   : > { %v936_v60 = vmax.f32 %v934_v44, %v935_v51  ;;  %v1746_v42 = vmax.f32 %v931_v7, %v932_v20  ;;  %v625_v44 = vadd.f32 %v1678_v31, %v1703_v61  ;;  %v1439_v20 = vld [vmem:[%s1623_s18] ss:$0 sm:$0xff] }
  0x8a   : > { %vm505_vm14 = vcmp.eq.s32.totalorder %v1616_v1, %v1439_v20 }
  0x8b   : > { %v937_v8 = vrot.slane %v936_v60, 2  ;;  %vm959_vm11 = vcmp.eq.f32.partialorder %v1674_v29, %v1746_v42 }
  0x8d   : > { %v938_v21 = vmax.f32 %v936_v60, %v937_v8 }
  0x92   : > { %v577_v25 = vpop.permute.xlu0 %576  ;;  %v570_v26 = vpop.permute.xlu1 %569 }
  0x93   : > { %v1667_v27 = vadd.f32 %v1664_v24, %v577_v25  ;;  %v1670_v28 = vadd.f32 %v1664_v24, %v570_v26  ;;  %v620_v9 = vadd.f32 %v570_v26, %v1703_v61  ;;  %v621_v10 = vadd.f32 %v577_v25, %v1703_v61 }
  0x95   : > { %v906_v30 = vsel %vm513_vm7, %v1667_v27, -inf  ;;  %v899_v33 = vsel %vm513_vm7, %v1670_v28, -inf }
  0x96   : > { %v907_v32 = vrot.slane %v906_v30, 4  ;;  %v900_v34 = vrot.slane %v899_v33, 4 }
  0x98   : > { %v908_v37 = vmax.f32 %v906_v30, %v907_v32  ;;  %v901_v38 = vmax.f32 %v899_v33, %v900_v34 }
  0x9a   : > { %v584_v39 = vpop.permute.xlu0 %583  ;;  %v591_v40 = vpop.permute.xlu1 %590  ;;  %v909_v45 = vrot.slane %v908_v37, 2  ;;  %v902_v46 = vrot.slane %v901_v38, 2 }
  0x9b   : > { %v1689_v41 = vadd.f32 %v1664_v24, %v584_v39  ;;  %v1692_v43 = vadd.f32 %v1664_v24, %v591_v40  ;;  %v622_v22 = vadd.f32 %v584_v39, %v1703_v61  ;;  %v623_v25 = vadd.f32 %v591_v40, %v1703_v61 }
  0x9c   : > { %v910_v54 = vmax.f32 %v908_v37, %v909_v45  ;;  %v903_v55 = vmax.f32 %v901_v38, %v902_v46  ;;  %v624_v40 = vadd.f32 %v1662_v23, %v1703_v61  ;;  %v939_v45 = vrot.slane %v938_v21, 1 }
  0x9d   : > { %v913_v47 = vsel %vm513_vm7, %v1689_v41, -inf  ;;  %v920_v49 = vsel %vm513_vm7, %v1692_v43, -inf }
  0x9e   : > { %v914_v48 = vrot.slane %v913_v47, 4  ;;  %v921_v56 = vrot.slane %v920_v49, 4  ;;  %v911_v62 = vrot.slane %v910_v54, 1  ;;  %v904_v63 = vrot.slane %v903_v55, 1 }
  0x9f   : > { %v1700_v53 = vpop.f32.mrf.mxu0 }
  0xa0   : > { %v915_v52 = vmax.f32 %v913_v47, %v914_v48  ;;  %v629_v58 = vrot.slane %v1700_v53, 1  ;;  %v922_v0 = vmax.f32 %v920_v49, %v921_v56  ;;  %v630_v3 = vrot.slane %v1700_v53, 2 }
  0xa1   : > { %v636_v4 = vperm.slane %v1700_v53, 0  ;;  %v631_v5 = vrot.slane %v1700_v53, 3  ;;  %v1712_v11 = vmax.f32 %v910_v54, %v911_v62  ;;  %v1714_v12 = vmax.f32 %v903_v55, %v904_v63 }
  0xa2   : > { %v916_v57 = vrot.slane %v915_v52, 2  ;;  %v637_v6 = vperm.slane %v629_v58, 0  ;;  %v923_v13 = vrot.slane %v922_v0, 2  ;;  %v632_v15 = vrot.slane %v1700_v53, 4 }
  0xa3   : > { %v638_v16 = vperm.slane %v630_v3, 0  ;;  %v1719_v17 = vadd.f32 %v636_v4, %v620_v9  ;;  %v639_v18 = vperm.slane %v631_v5, 0  ;;  %vm956_vm8 = vcmp.eq.f32.partialorder %v1667_v27, %v1712_v11 }
  0xa4   : > { %v917_v2 = vmax.f32 %v915_v52, %v916_v57  ;;  %v1723_v19 = vadd.f32 %v637_v6, %v621_v10  ;;  %vm955_vm9 = vcmp.eq.f32.partialorder %v1670_v28, %v1714_v12  ;;  %v924_v26 = vmax.f32 %v922_v0, %v923_v13 }
  0xa5   : > { %v640_v32 = vperm.slane %v632_v15, 0  ;;  %v1735_v33 = vadd.f32 %v638_v16, %v622_v22  ;;  %v660_v34 = vsel %vm513_vm7, %v1719_v17, -inf  ;;  %v633_v35 = vrot.slane %v1700_v53, 5 }
  0xa6   : > { %v918_v14 = vrot.slane %v917_v2, 1  ;;  %v1740_v37 = vadd.f32 %v639_v18, %v623_v25  ;;  %v661_v38 = vrot.slane %v660_v34, 4  ;;  %v667_v39 = vsel %vm513_vm7, %v1723_v19, -inf }
  0xa7   : > { %v964_v46 = vsel %vm956_vm8, %v1616_v1, 8  ;;  %v963_v47 = vsel %vm955_vm9, %v1616_v1, 8  ;;  %v925_v48 = vrot.slane %v924_v26, 1  ;;  %v1760_v23 = vadd.f32 %v640_v32, %v624_v40 }
  0xa8   : > { %v1731_v30 = vmax.f32 %v917_v2, %v918_v14  ;;  %v662_v49 = vmax.f32 %v660_v34, %v661_v38  ;;  %v668_v50 = vrot.slane %v667_v39, 4  ;;  %v674_v31 = vsel %vm513_vm7, %v1735_v33, -inf }
  0xa9   : > { %v641_v27 = vperm.slane %v633_v35, 0  ;;  %v675_v52 = vrot.slane %v674_v31, 4  ;;  %v681_v28 = vsel %vm513_vm7, %v1740_v37, -inf  ;;  %v1770_v54 = vmax.f32 %v938_v21, %v939_v45 }
  0xaa   : > { %vm957_vm10 = vcmp.eq.f32.partialorder %v1689_v41, %v1731_v30  ;;  %v663_v51 = vrot.slane %v662_v49, 2  ;;  %v981_v41 = vsel %vm513_vm7, %v964_v46, 2147483647  ;;  %v669_v55 = vmax.f32 %v667_v39, %v668_v50 }
  0xab   : > { %v965_v56 = vsel %vm957_vm10, %v1616_v1, 8  ;;  %v1774_v57 = vmax.f32 %v924_v26, %v925_v48  ;;  %v676_v60 = vmax.f32 %v674_v31, %v675_v52  ;;  %v971_v62 = vsel %vm513_vm7, %v963_v47, 2147483647  ;;  %v542_v52 = vpop.f32.mrf.mxu1 }
  0xac   : > { %v664_v59 = vmax.f32 %v662_v49, %v663_v51  ;;  %v670_v63 = vrot.slane %v669_v55, 2  ;;  %v682_v0 = vrot.slane %v681_v28, 4  ;;  %v688_v2 = vsel %vm513_vm7, %v1760_v23, -inf }
  0xad   : > { %v1779_v4 = vadd.f32 %v641_v27, %v625_v44  ;;  %v677_v7 = vrot.slane %v676_v60, 2  ;;  %v689_v8 = vrot.slane %v688_v2, 4  ;;  %v967_v9 = vsel %vm959_vm11, %v1616_v1, 8 }
  0xae   : > { %v665_v6 = vrot.slane %v664_v59, 1  ;;  %vm960_vm12 = vcmp.eq.f32.partialorder %v1686_v36, %v1770_v54  ;;  %v991_v10 = vsel %vm513_vm7, %v965_v56, 2147483647  ;;  %v671_v13 = vmax.f32 %v669_v55, %v670_v63 }
  0xaf   : > { %v982_v14 = vrot.slane %v981_v41, 4  ;;  %vm958_vm13 = vcmp.eq.f32.partialorder %v1692_v43, %v1774_v57  ;;  %v678_v18 = vmax.f32 %v676_v60, %v677_v7  ;;  %v972_v21 = vrot.slane %v971_v62, 4 }
  0xb0   : > { %v1790_v16 = vmax.f32 %v664_v59, %v665_v6  ;;  %v672_v22 = vrot.slane %v671_v13, 1  ;;  %v683_v25 = vmax.f32 %v681_v28, %v682_v0  ;;  %v690_v26 = vmax.f32 %v688_v2, %v689_v8  ;;  %v502_v6 = vld [vmem:[%s1623_s18] sm:$0x1] }
  0xb1   : > { %v992_v29 = vrot.slane %v991_v10, 4  ;;  %v679_v32 = vrot.slane %v678_v18, 1  ;;  %v695_v34 = vsel %vm513_vm7, %v1779_v4, -inf  ;;  %v966_v39 = vsel %vm958_vm13, %v1616_v1, 8  ;;  %v1828_v8 = vld [vmem:[%s439_s24] sm:$0x1] }
  0xb2   : > { %v716_v38 = vsub.f32 %v1719_v17, %v1790_v16  ;;  %v1798_v40 = vmax.f32 %v671_v13, %v672_v22  ;;  %v691_v43 = vrot.slane %v690_v26, 2  ;;  %v696_v44 = vrot.slane %v695_v34, 4 }
  0xb3   : > { %v968_v45 = vsel %vm960_vm12, %v1616_v1, 8  ;;  %v1804_v46 = vmax.f32 %v678_v18, %v679_v32  ;;  %vm983_vm15 = vcmp.lt.s32.totalorder %v981_v41, %v982_v14  ;;  %vm1807_vm0 = vcmp.lt.s32.totalorder %v971_v62, %v972_v21 }
  0xb4   : > { %v684_v17 = vrot.slane %v683_v25, 2  ;;  %v717_v48 = vsub.f32 %v1723_v19, %v1798_v40  ;;  %vm993_vm1 = vcmp.lt.s32.totalorder %v991_v10, %v992_v29  ;;  %v1001_v49 = vsel %vm513_vm7, %v966_v39, 2147483647 }
  0xb5   : > { %v692_v50 = vmax.f32 %v690_v26, %v691_v43  ;;  %v724_v36 = vmul.f32 1.442695, %v716_v38  ;;  %v697_v31 = vmax.f32 %v695_v34, %v696_v44  ;;  %v718_v27 = vsub.f32 %v1735_v33, %v1804_v46  ;;  %v560_v33 = vld [vmem:[#allocation5] sm:$0x1] }
  0xb6   : > { %v726_v51 = vmul.f32 1.442695, %v717_v48  ;;  %v1011_v28 = vsel %vm513_vm7, %v967_v9, 2147483647  ;;  %v1021_v55 = vsel %vm513_vm7, %v968_v45, 2147483647  ;;  %v984_v56 = vsel %vm983_vm15, %v981_v41, %v982_v14 }
  0xb7   : > { %v1538_v59 = vmov 0.0   ;;  %v974_v60 = vsel %vm1807_vm0, %v971_v62, %v972_v21  ;;  %v994_v63 = vsel %vm993_vm1, %v991_v10, %v992_v29  ;;  %v1002_v0 = vrot.slane %v1001_v49, 4 }
  0xb8   : > { %v1387_v19 = vsel %vm505_vm14, 1.0, %v1538_v59  ;;  %v685_v2 = vmax.f32 %v683_v25, %v684_v17  ;;  %v693_v7 = vrot.slane %v692_v50, 1  ;;  %1440 = vpow2.f32 %v724_v36 }
  0xb9   : > { %v512_v41 = vmul.f32 %v1387_v19, %v1700_v53  ;;  %v545_v9 = vmul.f32 %v1387_v19, %v542_v52  ;;  %v698_v13 = vrot.slane %v697_v31, 2  ;;  %1442 = vpow2.f32 %v726_v51 }
  0xba   : > { %v728_v14 = vmul.f32 1.442695, %v718_v27  ;;  %vm559_vm2 = vcmp.gt.f32.partialorder %v1828_v8, 0.0  ;;  %v1012_v20 = vrot.slane %v1011_v28, 4  ;;  %vm1003_vm5 = vcmp.lt.s32.totalorder %v1001_v49, %v1002_v0 }
  0xbb   : > { %v514_v62 = vsel %vm513_vm7, %v512_v41, 0.0  ;;  %v546_v10 = vsel %vm513_vm7, %v545_v9, 0.0  ;;  %v561_v18 = vsel %vm559_vm2, %v502_v6, %v560_v33  ;;  %v1022_v22 = vrot.slane %v1021_v55, 4 }
  0xbc   : > { %v515_v21 = vrot.slane %v514_v62, 4  ;;  %562 = vst.msk [vmem:[#allocation5] sm:$0x1] %vm557_vm4, %v561_v18  ;;  %v985_v25 = vrot.slane %v984_v56, 2  ;;  %v686_v26 = vrot.slane %v685_v2, 1  ;;  %v547_v29 = vrot.slane %v546_v10, 4 }
  0xbd   : > { %v975_v32 = vrot.slane %v974_v60, 2  ;;  %v995_v34 = vrot.slane %v994_v63, 2  ;;  %v1835_v38 = vmax.f32 %v692_v50, %v693_v7  ;;  %v1004_v44 = vsel %vm1003_vm5, %v1001_v49, %v1002_v0 }
  0xbe   : > { %v516_v39 = vadd.f32 %v515_v21, %v514_v62  ;;  %v1441_v43 = vpop.eup %1440  ;;  %v699_v45 = vmax.f32 %v697_v31, %v698_v13  ;;  %1444 = vpow2.f32 %v728_v14  ;;  %v548_v47 = vadd.f32 %v547_v29, %v546_v10 }
  0xbf   : > { %v1443_v17 = vpop.eup %1442  ;;  %vm1013_vm6 = vcmp.lt.s32.totalorder %v1011_v28, %v1012_v20  ;;  %vm1023_vm8 = vcmp.lt.s32.totalorder %v1021_v55, %v1022_v22  ;;  %vm1837_vm9 = vcmp.lt.s32.totalorder %v984_v56, %v985_v25  ;;  %v1841_v27 = vmax.f32 %v685_v2, %v686_v26 }
  0xc0   : > { %v517_v48 = vrot.slane %v516_v39, 2  ;;  %v549_v51 = vrot.slane %v548_v47, 2  ;;  %vm976_vm10 = vcmp.lt.s32.totalorder %v974_v60, %v975_v32  ;;  %v1005_v50 = vrot.slane %v1004_v44, 2 }
  0xc1   : > { %v720_v52 = vsub.f32 %v1760_v23, %v1835_v38  ;;  %vm996_vm11 = vcmp.lt.s32.totalorder %v994_v63, %v995_v34  ;;  %v700_v31 = vrot.slane %v699_v45, 1  ;;  %v740_v59 = vsel %vm513_vm7, %v1441_v43, 0.0 }
  0xc2   : > { %v518_v49 = vadd.f32 %v517_v48, %v516_v39  ;;  %v550_v19 = vadd.f32 %v549_v51, %v548_v47  ;;  %v1014_v0 = vsel %vm1013_vm6, %v1011_v28, %v1012_v20  ;;  %v1024_v6 = vsel %vm1023_vm8, %v1021_v55, %v1022_v22 }
  0xc3   : > { %v747_v33 = vsel %vm513_vm7, %v1443_v17, 0.0  ;;  %v987_v2 = vsel %vm1837_vm9, %v984_v56, %v985_v25  ;;  %v977_v9 = vsel %vm976_vm10, %v974_v60, %v975_v32  ;;  %v719_v13 = vsub.f32 %v1740_v37, %v1841_v27 }
  0xc4   : > { %v519_v7 = vrot.slane %v518_v49, 1  ;;  %v1445_v41 = vpop.eup %1444  ;;  %v551_v23 = vrot.slane %v550_v19, 1  ;;  %v997_v14 = vsel %vm996_vm11, %v994_v63, %v995_v34  ;;  %v732_v62 = vmul.f32 1.442695, %v720_v52  ;;  %v553_v34 = vld [vmem:[#allocation4] sm:$0x1] }
  0xc5   : > { %v741_v10 = vrot.slane %v740_v59, 4  ;;  %vm1006_vm12 = vcmp.lt.s32.totalorder %v1004_v44, %v1005_v50  ;;  %v1851_v21 = vmax.f32 %v699_v45, %v700_v31  ;;  %v748_v28 = vrot.slane %v747_v33, 4 }
  0xc6   : > { %v520_v18 = vadd.f32 %v519_v7, %v518_v49  ;;  %v552_v55 = vadd.f32 %v551_v23, %v550_v19  ;;  %v1015_v20 = vrot.slane %v1014_v0, 2  ;;  %v1025_v22 = vrot.slane %v1024_v6, 2  ;;  %v612_v19 = vpop.permute.xlu0 %611 }
  0xc7   : > { %v754_v26 = vsel %vm513_vm7, %v1445_v41, 0.0  ;;  %v988_v29 = vrot.slane %v987_v2, 1  ;;  %v978_v56 = vrot.slane %v977_v9, 1  ;;  %v730_v60 = vmul.f32 1.442695, %v719_v13 }
  0xc8   : > { %v554_v25 = vadd.f32 %v552_v55, %v520_v18  ;;  %v998_v32 = vrot.slane %v997_v14, 1  ;;  %v1007_v37 = vsel %vm1006_vm12, %v1004_v44, %v1005_v50  ;;  %1446 = vpow2.f32 %v732_v62 }
  0xc9   : > { %v742_v63 = vadd.f32 %v741_v10, %v740_v59  ;;  %v721_v39 = vsub.f32 %v1779_v4, %v1851_v21  ;;  %v749_v43 = vadd.f32 %v748_v28, %v747_v33  ;;  %v755_v45 = vrot.slane %v754_v26, 4 }
  0xca   : > { %v555_v47 = vmul.f32 %v554_v25, %v1828_v8  ;;  %v634_v17 = vrot.slane %v1700_v53, 6  ;;  %vm1858_vm13 = vcmp.lt.s32.totalorder %v1014_v0, %v1015_v20  ;;  %vm1862_vm14 = vcmp.lt.s32.totalorder %v1024_v6, %v1025_v22 }
  0xcb   : > { %1448 = vpow2.f32 %v730_v60  ;;  %vm1866_vm15 = vcmp.lt.s32.totalorder %v987_v2, %v988_v29  ;;  %vm1870_vm0 = vcmp.lt.s32.totalorder %v977_v9, %v978_v56  ;;  %v1008_v50 = vrot.slane %v1007_v37, 1 }
  0xcc   : > { %v556_v44 = vadd.f32 %v555_v47, %v553_v34  ;;  %v743_v52 = vrot.slane %v742_v63, 2  ;;  %vm999_vm1 = vcmp.lt.s32.totalorder %v997_v14, %v998_v32  ;;  %v734_v49 = vmul.f32 1.442695, %v721_v39 }
  0xcd   : > { %v750_v31 = vrot.slane %v749_v43, 2  ;;  %v756_v59 = vadd.f32 %v755_v45, %v754_v26  ;;  %vm868_vm2 = vcmask 1041409   ;;  %vm871_vm5 = vcmask 1042434  }
  0xce   : > { %558 = vst.msk [vmem:[#allocation4] sm:$0x1] %vm557_vm4, %v556_v44  ;;  %v1447_v33 = vpop.eup %1446  ;;  %vm874_vm6 = vcmask 1043459   ;;  %v642_v7 = vperm.slane %v634_v17, 0  ;;  %v1879_v41 = vsel %vm1858_vm13, %v1014_v0, %v1015_v20  ;;  %v1883_v13 = vsel %vm1862_vm14, %v1024_v6, %v1025_v22 }
  0xcf   : > { %v990_v23 = vsel %vm1866_vm15, %v987_v2, %v988_v29  ;;  %v980_v62 = vsel %vm1870_vm0, %v977_v9, %v978_v56  ;;  %v1000_v10 = vsel %vm999_vm1, %v997_v14, %v998_v32  ;;  %vm1009_vm8 = vcmp.lt.s32.totalorder %v1007_v37, %v1008_v50 }
  0xd0   : > { %v744_v18 = vadd.f32 %v743_v52, %v742_v63  ;;  %v626_v28 = vadd.f32 %v612_v19, %v1703_v61  ;;  %1450 = vpow2.f32 %v734_v49  ;;  %v751_v26 = vadd.f32 %v750_v31, %v749_v43 }
  0xd1   : > { %v1449_v55 = vpop.eup %1448  ;;  %v757_v0 = vrot.slane %v756_v59, 2  ;;  %v768_v20 = vsel %vm513_vm7, %v1447_v33, 0.0  ;;  %v1018_v6 = vrot.slane %v1879_v41, 1  ;;  %v1051_v22 = vsel %vm868_vm2, %v990_v23, %v980_v62 }
  0xd2   : > { %v501_v2 = vsub.f32 1.0, %v1828_v8  ;;  %v1894_v29 = vadd.f32 %v642_v7, %v626_v28  ;;  %v1028_v9 = vrot.slane %v1883_v13, 1  ;;  %v1052_v14 = vsel %vm871_vm5, %v1000_v10, %v1051_v22  ;;  %v619_v28 = vpop.permute.xlu1 %618 }
  0xd3   : > { %v1010_v56 = vsel %vm1009_vm8, %v1007_v37, %v1008_v50  ;;  %v1899_v60 = vadd.f32 %v1664_v24, %v612_v19  ;;  %v745_v25 = vrot.slane %v744_v18, 1  ;;  %v761_v32 = vsel %vm513_vm7, %v1449_v55, 0.0 }
  0xd4   : > { %v769_v63 = vrot.slane %v768_v20, 4  ;;  %v702_v34 = vsel %vm513_vm7, %v1894_v29, -inf  ;;  %v752_v39 = vrot.slane %v751_v26, 1  ;;  %v758_v43 = vadd.f32 %v757_v0, %v756_v59 }
  0xd5   : > { %v703_v45 = vrot.slane %v702_v34, 4  ;;  %v941_v47 = vsel %vm513_vm7, %v1899_v60, -inf  ;;  %v1907_v48 = vsel %vm874_vm6, %v1010_v56, %v1052_v14  ;;  %v1067_v37 = vadd.f32 %v1714_v12, %v1700_v53 }
  0xd6   : > { %v832_v36 = vperm.slane %v501_v2, 0  ;;  %v942_v44 = vrot.slane %v941_v47, 4  ;;  %v1451_v51 = vpop.eup %1450  ;;  %v762_v4 = vrot.slane %v761_v32, 4  ;;  %v1068_v50 = vadd.f32 %v1712_v11, %v629_v58 }
  0xd7   : > { %v1069_v52 = vadd.f32 %v1731_v30, %v630_v3  ;;  %v704_v49 = vmax.f32 %v702_v34, %v703_v45  ;;  %v746_v31 = vadd.f32 %v745_v25, %v744_v18  ;;  %v1070_v59 = vadd.f32 %v1774_v57, %v631_v5 }
  0xd8   : > { %v770_v19 = vadd.f32 %v769_v63, %v768_v20  ;;  %v943_v12 = vmax.f32 %v941_v47, %v942_v44  ;;  %v753_v33 = vadd.f32 %v752_v39, %v751_v26  ;;  %v759_v7 = vrot.slane %v758_v43, 1 }
  0xd9   : > { %v1071_v23 = vadd.f32 %v1746_v42, %v632_v15  ;;  %v705_v62 = vrot.slane %v704_v49, 2  ;;  %v1924_v58 = vperm.slane %v1828_v8, 0  ;;  %v1927_v3 = vmul.f32 %v1664_v24, %v832_v36 }
  0xda   : > { %v775_v11 = vsel %vm513_vm7, %v1451_v51, 0.0  ;;  %v944_v30 = vrot.slane %v943_v12, 2  ;;  %v763_v10 = vadd.f32 %v762_v4, %v761_v32  ;;  %v1072_v5 = vadd.f32 %v1770_v54, %v633_v35 }
  0xdb   : > { %v1934_v57 = vmul.f32 %v832_v36, %v1703_v61  ;;  %v706_v18 = vmax.f32 %v704_v49, %v705_v62  ;;  %1452 = vlog2.f32 %v746_v31  ;;  %v771_v15 = vrot.slane %v770_v19, 2 }
  0xdc   : > { %v945_v42 = vmax.f32 %v943_v12, %v944_v30  ;;  %v635_v8 = vrot.slane %v1700_v53, 7  ;;  %v1937_v55 = vadd.f32 %v759_v7, %v758_v43  ;;  %1454 = vlog2.f32 %v753_v33 }
  0xdd   : > { %v776_v26 = vrot.slane %v775_v11, 4  ;;  %v707_v0 = vrot.slane %v706_v18, 1  ;;  %v1076_v20 = vmul.f32 %v1068_v50, %v1924_v58  ;;  %v1085_v22 = vrot.slane %v1927_v3, 1 }
  0xde   : > { %v946_v35 = vrot.slane %v945_v42, 1  ;;  %v643_v54 = vperm.slane %v635_v8, 0  ;;  %v1077_v2 = vmul.f32 %v1069_v52, %v1924_v58  ;;  %v1086_v14 = vrot.slane %v1927_v3, 2 }
  0xdf   : > { %v1945_v56 = vmax.f32 %v706_v18, %v707_v0  ;;  %v627_v25 = vadd.f32 %v619_v28, %v1703_v61  ;;  %v1948_v32 = vadd.f32 %v771_v15, %v770_v19  ;;  %v764_v63 = vrot.slane %v763_v10, 2 }
  0xe0   : > { %v947_v34 = vmax.f32 %v945_v42, %v946_v35  ;;  %v1951_v39 = vadd.f32 %v1664_v24, %v619_v28  ;;  %v777_v43 = vadd.f32 %v776_v26, %v775_v11  ;;  %v1087_v45 = vrot.slane %v1927_v3, 3 }
  0xe1   : > { %v722_v47 = vsub.f32 %v1894_v29, %v1945_v56  ;;  %v1956_v36 = vadd.f32 %v643_v54, %v627_v25  ;;  %v1958_v44 = vpop.eup %1452  ;;  %v1101_v51 = vadd.f32 %v1085_v22, %v1076_v20  ;;  %v1078_v61 = vmul.f32 %v1070_v59, %v1924_v58 }
  0xe2   : > { %vm961_vm9 = vcmp.eq.f32.partialorder %v1899_v60, %v947_v34  ;;  %v948_v4 = vsel %vm513_vm7, %v1951_v39, -inf  ;;  %v1455_v24 = vpop.eup %1454  ;;  %v1079_v50 = vmul.f32 %v1071_v23, %v1924_v58  ;;  %v1102_v52 = vadd.f32 %v1086_v14, %v1077_v2 }
  0xe3   : > { %v736_v49 = vmul.f32 1.442695, %v722_v47  ;;  %v969_v31 = vsel %vm961_vm9, %v1616_v1, 8  ;;  %v765_v29 = vadd.f32 %v764_v63, %v763_v10  ;;  %v1075_v12 = vmul.f32 %v1067_v37, %v1924_v58 }
  0xe4   : > { %v1031_v19 = vsel %vm513_vm7, %v969_v31, 2147483647  ;;  %v709_v60 = vsel %vm513_vm7, %v1956_v36, -inf  ;;  %v949_v7 = vrot.slane %v948_v4, 4  ;;  %v773_v62 = vrot.slane %v1948_v32, 1 }
  0xe5   : > { %1456 = vpow2.f32 %v736_v49  ;;  %v1032_v59 = vrot.slane %v1031_v19, 4  ;;  %v710_v33 = vrot.slane %v709_v60, 4  ;;  %v778_v11 = vrot.slane %v777_v43, 2 }
  0xe6   : > { %v1116_v23 = vrot.slane %v1101_v51, 7  ;;  %v1103_v30 = vadd.f32 %v1087_v45, %v1078_v61  ;;  %vm877_vm10 = vcmask 1044484   ;;  %v1073_v10 = vadd.f32 %v947_v34, %v634_v17 }
  0xe7   : > { %vm1033_vm11 = vcmp.lt.s32.totalorder %v1031_v19, %v1032_v59  ;;  %v711_v18 = vmax.f32 %v709_v60, %v710_v33  ;;  %v950_v15 = vmax.f32 %v948_v4, %v949_v7  ;;  %v1088_v37 = vrot.slane %v1927_v3, 4 }
  0xe8   : > { %v1118_v42 = vrot.slane %v1102_v52, 6  ;;  %v1034_v28 = vsel %vm1033_vm11, %v1031_v19, %v1032_v59  ;;  %v1100_v26 = vadd.f32 %v1927_v3, %v1075_v12  ;;  %v1080_v0 = vmul.f32 %v1072_v5, %v1924_v58 }
  0xe9   : > { %v766_v20 = vrot.slane %v765_v29, 1  ;;  %v712_v22 = vrot.slane %v711_v18, 2  ;;  %v951_v35 = vrot.slane %v950_v15, 2  ;;  %v1089_v54 = vrot.slane %v1927_v3, 5 }
  0xea   : > { %v1090_v2 = vrot.slane %v1927_v3, 6  ;;  %v1035_v14 = vrot.slane %v1034_v28, 2  ;;  %v1117_v17 = vsel %vm868_vm2, %v1116_v23, %v1100_v26  ;;  %vm880_vm12 = vcmask 1045509  }
  0xeb   : > { %v1457_v25 = vpop.eup %1456  ;;  %v1081_v63 = vmul.f32 %v1073_v10, %v1924_v58  ;;  %v1120_v34 = vrot.slane %v1103_v30, 5  ;;  %v713_v45 = vmax.f32 %v711_v18, %v712_v22  ;;  %v952_v47 = vmax.f32 %v950_v15, %v951_v35 }
  0xec   : > { %v779_v51 = vadd.f32 %v778_v11, %v777_v43  ;;  %vm883_vm13 = vcmask 1046534   ;;  %v1104_v5 = vadd.f32 %v1088_v37, %v1079_v50  ;;  %v782_v61 = vsel %vm513_vm7, %v1457_v25, 0.0 }
  0xed   : > { %v1119_v4 = vsel %vm871_vm5, %v1118_v42, %v1117_v17  ;;  %1458 = vlog2.f32 %v1937_v55  ;;  %v767_v52 = vadd.f32 %v766_v20, %v765_v29  ;;  %v783_v49 = vrot.slane %v782_v61, 4 }
  0xee   : > { %v714_v31 = vrot.slane %v713_v45, 1  ;;  %vm1986_vm14 = vcmp.lt.s32.totalorder %v1879_v41, %v1018_v6  ;;  %vm1993_vm15 = vcmp.lt.s32.totalorder %v1883_v13, %v1028_v9  ;;  %v774_v50 = vadd.f32 %v773_v62, %v1948_v32 }
  0xef   : > { %v1105_v55 = vadd.f32 %v1089_v54, %v1080_v0  ;;  %vm1036_vm0 = vcmp.lt.s32.totalorder %v1034_v28, %v1035_v14  ;;  %v953_v29 = vrot.slane %v952_v47, 1  ;;  %v784_v12 = vadd.f32 %v783_v49, %v782_v61 }
  0xf0   : > { %v1106_v60 = vadd.f32 %v1090_v2, %v1081_v63  ;;  %v1121_v59 = vsel %vm874_vm6, %v1120_v34, %v1119_v4  ;;  %v1999_v33 = vmax.f32 %v713_v45, %v714_v31  ;;  %v799_v7 = vmul.f32 0.6931472, %v1455_v24 }
  0xf1   : > { %v780_v11 = vrot.slane %v779_v51, 1  ;;  %v1122_v23 = vrot.slane %v1104_v5, 4  ;;  %v954_v30 = vmax.f32 %v952_v47, %v953_v29  ;;  %v785_v10 = vrot.slane %v784_v12, 2 }
  0xf2   : > { %1460 = vlog2.f32 %v767_v52  ;;  %v1037_v18 = vsel %vm1036_vm0, %v1034_v28, %v1035_v14  ;;  %v723_v15 = vsub.f32 %v1956_v36, %v1999_v33  ;;  %v1091_v62 = vrot.slane %v1927_v3, 7 }
  0xf3   : > { %v1123_v32 = vsel %vm877_vm10, %v1122_v23, %v1121_v59  ;;  %vm962_vm1 = vcmp.eq.f32.partialorder %v1951_v39, %v954_v30  ;;  %v1074_v37 = vadd.f32 %v954_v30, %v635_v8  ;;  %v1459_v42 = vpop.eup %1458  ;;  %v786_v24 = vadd.f32 %v785_v10, %v784_v12 }
  0xf4   : > { %v1126_v26 = vrot.slane %v1106_v60, 2  ;;  %v738_v0 = vmul.f32 1.442695, %v723_v15  ;;  %v970_v20 = vsel %vm962_vm1, %v1616_v1, 8  ;;  %v1124_v22 = vrot.slane %v1105_v55, 3 }
  0xf5   : > { %v1038_v28 = vrot.slane %v1037_v18, 1  ;;  %v1041_v35 = vsel %vm513_vm7, %v970_v20, 2147483647  ;;  %v1082_v36 = vmul.f32 %v1074_v37, %v1924_v58  ;;  %v781_v54 = vadd.f32 %v780_v11, %v779_v51 }
  0xf6   : > { %v787_v2 = vrot.slane %v786_v24, 1  ;;  %1462 = vpow2.f32 %v738_v0  ;;  %v1042_v3 = vrot.slane %v1041_v35, 4  ;;  %v801_v39 = vmul.f32 0.6931472, %v1459_v42 }
  0xf7   : > { %1464 = vlog2.f32 %v774_v50  ;;  %v1125_v53 = vsel %vm880_vm12, %v1124_v22, %v1123_v32  ;;  %v1107_v8 = vadd.f32 %v1091_v62, %v1082_v36  ;;  %v813_v17 = vadd.f32 %v799_v7, %v1798_v40 }
  0xf8   : > { %v1461_v14 = vpop.eup %1460  ;;  %v1127_v25 = vsel %vm883_vm13, %v1126_v26, %v1125_v53  ;;  %vm886_vm8 = vcmask 1047559   ;;  %vm1043_vm9 = vcmp.lt.s32.totalorder %v1041_v35, %v1042_v3  ;;  %v788_v63 = vadd.f32 %v787_v2, %v786_v24 }
  0xf9   : > { %vm1039_vm11 = vcmp.lt.s32.totalorder %v1037_v18, %v1038_v28  ;;  %v1044_v34 = vsel %vm1043_vm9, %v1041_v35, %v1042_v3  ;;  %v1128_v45 = vrot.slane %v1107_v8, 1  ;;  %v1020_v47 = vsel %vm1986_vm14, %v1879_v41, %v1018_v6 }
  0xfa   : > { %v1030_v40 = vsel %vm1993_vm15, %v1883_v13, %v1028_v9  ;;  %1466 = vlog2.f32 %v781_v54  ;;  %v1045_v51 = vrot.slane %v1044_v34, 2  ;;  %v1054_v5 = vsel %vm877_vm10, %v1020_v47, %v1907_v48 }
  0xfb   : > { %v797_v61 = vmul.f32 0.6931472, %v1958_v44  ;;  %v836_v4 = vrot.slane %v1934_v57, 1  ;;  %v1129_v52 = vsel %vm886_vm8, %v1128_v45, %v1127_v25  ;;  %v814_v41 = vadd.f32 %v801_v39, %v1804_v46 }
  0xfc   : > { %v1463_v49 = vpop.eup %1462  ;;  %v824_v6 = vmul.f32 %v1924_v58, %v813_v17  ;;  %v1040_v31 = vsel %vm1039_vm11, %v1037_v18, %v1038_v28  ;;  %vm1046_vm14 = vcmp.lt.s32.totalorder %v1044_v34, %v1045_v51  ;;  %1131 = vst.msk [vmem:[#allocation3] sm:$0xff] %vm513_vm7, %v1129_v52  ;;  %v803_v9 = vmul.f32 0.6931472, %v1461_v14 }
  0xfd   : > { %v1465_v13 = vpop.eup %1464  ;;  %1468 = vlog2.f32 %v788_v63  ;;  %v789_v48 = vsel %vm513_vm7, %v1463_v49, 0.0  ;;  %v1047_v19 = vsel %vm1046_vm14, %v1044_v34, %v1045_v51  ;;  %v1055_v44 = vsel %vm880_vm12, %v1030_v40, %v1054_v5 }
  0xfe   : > { %v790_v43 = vrot.slane %v789_v48, 4  ;;  %v1048_v50 = vrot.slane %v1047_v19, 1  ;;  %v812_v55 = vadd.f32 %v797_v61, %v1790_v16  ;;  %v837_v46 = vrot.slane %v1934_v57, 2 }
  0xff   : > { %v1056_v29 = vsel %vm883_vm13, %v1040_v31, %v1055_v44  ;;  %v805_v60 = vmul.f32 0.6931472, %v1465_v13  ;;  %v825_v59 = vmul.f32 %v1924_v58, %v814_v41  ;;  %v852_v11 = vadd.f32 %v836_v4, %v824_v6 }
 0x100   : > { %v1467_v12 = vpop.eup %1466  ;;  %v791_v7 = vadd.f32 %v790_v43, %v789_v48  ;;  %vm1049_vm15 = vcmp.lt.s32.totalorder %v1047_v19, %v1048_v50  ;;  %v815_v23 = vadd.f32 %v803_v9, %v1841_v27  ;;  %v823_v32 = vmul.f32 %v1924_v58, %v812_v55 }
 0x101   : > { %v1050_v30 = vsel %vm1049_vm15, %v1047_v19, %v1048_v50  ;;  %v807_v16 = vmul.f32 0.6931472, %v1467_v12  ;;  %v816_v62 = vadd.f32 %v805_v60, %v1835_v38  ;;  %v853_v37 = vadd.f32 %v837_v46, %v825_v59 }
 0x102   : > { %v792_v10 = vrot.slane %v791_v7, 2  ;;  %v1057_v18 = vsel %vm886_vm8, %v1050_v30, %v1056_v29  ;;  %v838_v24 = vrot.slane %v1934_v57, 3  ;;  %v867_v26 = vrot.slane %v852_v11, 7 }
 0x103   : > { %v1469_v15 = vpop.eup %1468  ;;  %1058 = vst.msk [vmem:[%s1642_s16] sm:$0xff] %vm513_vm7, %v1057_v18  ;;  %v826_v0 = vmul.f32 %v1924_v58, %v815_v23  ;;  %v817_v22 = vadd.f32 %v807_v16, %v1851_v21  ;;  %v851_v28 = vadd.f32 %v1934_v57, %v823_v32  ;;  %v827_v35 = vmul.f32 %v1924_v58, %v816_v62 }
 0x104   : > { %v793_v42 = vadd.f32 %v792_v10, %v791_v7  ;;  %v809_v27 = vmul.f32 0.6931472, %v1469_v15  ;;  %v839_v36 = vrot.slane %v1934_v57, 4  ;;  %v870_v54 = vrot.slane %v853_v37, 6 }
 0x105   : > { %v854_v38 = vadd.f32 %v838_v24, %v826_v0  ;;  %v869_v3 = vsel %vm868_vm2, %v867_v26, %v851_v28  ;;  %v828_v53 = vmul.f32 %v1924_v58, %v817_v22  ;;  %v840_v8 = vrot.slane %v1934_v57, 5 }
 0x106   : > { %v794_v20 = vrot.slane %v793_v42, 1  ;;  %v818_v39 = vadd.f32 %v809_v27, %v1945_v56  ;;  %v855_v14 = vadd.f32 %v839_v36, %v827_v35  ;;  %v872_v21 = vsel %vm871_vm5, %v870_v54, %v869_v3 }
 0x107   : > { %v873_v17 = vrot.slane %v854_v38, 5  ;;  %v841_v25 = vrot.slane %v1934_v57, 6  ;;  %v856_v34 = vadd.f32 %v840_v8, %v828_v53  ;;  %v842_v4 = vrot.slane %v1934_v57, 7 }
 0x108   : > { %v795_v2 = vadd.f32 %v794_v20, %v793_v42  ;;  %v829_v63 = vmul.f32 %v1924_v58, %v818_v39  ;;  %v876_v40 = vrot.slane %v855_v14, 4 }
 0x109   : > { %v875_v45 = vsel %vm874_vm6, %v873_v17, %v872_v21  ;;  %v879_v61 = vrot.slane %v856_v34, 3 }
 0x10a   : > { %1470 = vlog2.f32 %v795_v2  ;;  %v857_v56 = vadd.f32 %v841_v25, %v829_v63  ;;  %v878_v5 = vsel %vm877_vm10, %v876_v40, %v875_v45 }
 0x10b   : > { %v881_v49 = vsel %vm880_vm12, %v879_v61, %v878_v5 }
 0x10c   : > { %v882_v6 = vrot.slane %v857_v56, 2 }
 0x10e   : > { %v884_v13 = vsel %vm883_vm13, %v882_v6, %v881_v49 }
 0x110   : > { %v1471_v47 = vpop.eup %1470 }
 0x111   : > { %v811_v51 = vmul.f32 0.6931472, %v1471_v47 }
 0x113   : > { %v819_v52 = vadd.f32 %v811_v51, %v1999_v33 }
 0x115   : > { %v830_v41 = vmul.f32 %v1924_v58, %v819_v52 }
 0x117   : > { %v858_v31 = vadd.f32 %v842_v4, %v830_v41 }
 0x118   : > { %1135 = sbr.rel (%p1391_p6) target bundleno = 455 (0x1c7), region = 56 }
 0x119   : > { %v885_v9 = vrot.slane %v858_v31, 1 }
 0x11b   : > { %v887_v48 = vsel %vm886_vm8, %v885_v9, %v884_v13 }
 0x11c   : > { %889 = vst.msk [vmem:[#allocation2] sm:$0xff] %vm513_vm7, %v887_v48 }
 0x11d   : > { %v1136_v57 = vld [vmem:[%s2099_s3] sm:$0xff]  ;;  %v1539_v33 = vmov 0   ;;  %v1177_v19 = vld [vmem:[#allocation3] sm:$0xff]  ;;  %v1473_v7 = vld [vmem:[#allocation5] ss:$0 sm:$0xff]  ;;  %vm1204_vm13 = vcmask 10240  }
 0x11e   : > { %1472 = vset.pattern.permute.xlu0 %v1539_v33  ;;  %vm1166_vm2 = vcmp.eq.s32.totalorder %v1616_v1, %v1473_v7  ;;  %v1175_v45 = vld [vmem:[#allocation4] sm:$0x1] }
 0x11f   : > { %1140 = vperm.xlu0 %1472, %v1136_v57  }
 0x123   : > { %v1137_v58 = vld [vmem:[#allocation2] sm:$0xff] }
 0x191   : > { %v1141_v44 = vpop.permute.xlu0 %1140 }
 0x192   : > { %v1143_v43 = vadd.f32 %v1141_v44, %v1137_v58  ;;  %v1178_v50 = vadd.f32 %v1177_v19, %v1141_v44  ;;  %v1167_v62 = vsel %vm1166_vm2, %v1141_v44, 0.0 }
 0x193   : > { %v1168_v26 = vsel %vm513_vm7, %v1167_v62, 0.0 }
 0x194   : > { %v1144_v55 = vsel %vm513_vm7, %v1143_v43, -inf  ;;  %v1179_v46 = vsel %vm513_vm7, %v1178_v50, -inf  ;;  %v1169_v20 = vrot.slane %v1168_v26, 4 }
 0x195   : > { %v1145_v29 = vrot.slane %v1144_v55, 4  ;;  %v1180_v12 = vrot.slane %v1179_v46, 4 }
 0x196   : > { %v1170_v35 = vadd.f32 %v1169_v20, %v1168_v26 }
 0x197   : > { %v1146_v60 = vmax.f32 %v1144_v55, %v1145_v29  ;;  %v1181_v59 = vmax.f32 %v1179_v46, %v1180_v12 }
 0x199   : > { %v1147_v11 = vrot.slane %v1146_v60, 2  ;;  %v1182_v23 = vrot.slane %v1181_v59, 2 }
 0x19b   : > { %v1148_v30 = vmax.f32 %v1146_v60, %v1147_v11  ;;  %v1183_v10 = vmax.f32 %v1181_v59, %v1182_v23 }
 0x19d   : > { %v1149_v18 = vrot.slane %v1148_v30, 1  ;;  %v1184_v15 = vrot.slane %v1183_v10, 1 }
 0x19f   : > { %v1150_v16 = vmax.f32 %v1148_v30, %v1149_v18  ;;  %v1185_v32 = vmax.f32 %v1183_v10, %v1184_v15 }
 0x1a1   : > { %v1151_v37 = vsub.f32 %v1143_v43, %v1150_v16  ;;  %vm1186_vm5 = vcmp.eq.f32.partialorder %v1178_v50, %v1185_v32 }
 0x1a2   : > { %v1187_v42 = vsel %vm1186_vm5, %v1616_v1, 8  ;;  %v1171_v1 = vrot.slane %v1170_v35, 2 }
 0x1a3   : > { %v1152_v24 = vmul.f32 1.442695, %v1151_v37  ;;  %v1188_v0 = vsel %vm513_vm7, %v1187_v42, 2147483647 }
 0x1a4   : > { %v1189_v27 = vrot.slane %v1188_v0, 4  ;;  %v1172_v14 = vadd.f32 %v1171_v1, %v1170_v35 }
 0x1a5   : > { %1474 = vpow2.f32 %v1152_v24 }
 0x1a6   : > { %vm1190_vm6 = vcmp.lt.s32.totalorder %v1188_v0, %v1189_v27  ;;  %v1173_v25 = vrot.slane %v1172_v14, 1 }
 0x1a7   : > { %v1191_v22 = vsel %vm1190_vm6, %v1188_v0, %v1189_v27 }
 0x1a8   : > { %v1192_v28 = vrot.slane %v1191_v22, 2  ;;  %v1174_v34 = vadd.f32 %v1173_v25, %v1172_v14 }
 0x1aa   : > { %vm1193_vm10 = vcmp.lt.s32.totalorder %v1191_v22, %v1192_v28  ;;  %v1176_v47 = vadd.f32 %v1175_v45, %v1174_v34 }
 0x1ab   : > { %v1475_v36 = vpop.eup %1474  ;;  %v1194_v54 = vsel %vm1193_vm10, %v1191_v22, %v1192_v28 }
 0x1ac   : > { %v1154_v2 = vsel %vm513_vm7, %v1475_v36, 0.0  ;;  %v1195_v38 = vrot.slane %v1194_v54, 1  ;;  %vm1202_vm7 = vcmask 1041408   ;;  %v1199_v5 = vperm.slane %v1176_v47, 0 }
 0x1ad   : > { %v1155_v3 = vrot.slane %v1154_v2, 4 }
 0x1ae   : > { %vm1196_vm12 = vcmp.lt.s32.totalorder %v1194_v54, %v1195_v38 }
 0x1af   : > { %v1156_v39 = vadd.f32 %v1155_v3, %v1154_v2  ;;  %v1197_v53 = vsel %vm1196_vm12, %v1194_v54, %v1195_v38 }
 0x1b0   : > { %1206 = vst.msk [vmem:[#allocation6] sm:$0x1] %vm557_vm4, %v1197_v53 }
 0x1b1   : > { %v1157_v8 = vrot.slane %v1156_v39, 2 }
 0x1b3   : > { %v1158_v21 = vadd.f32 %v1157_v8, %v1156_v39 }
 0x1b5   : > { %v1159_v17 = vrot.slane %v1158_v21, 1 }
 0x1b7   : > { %v1160_v63 = vadd.f32 %v1159_v17, %v1158_v21 }
 0x1b9   : > { %1476 = vlog2.f32 %v1160_v63 }
 0x1bf   : > { %v1477_v40 = vpop.eup %1476 }
 0x1c0   : > { %v1162_v51 = vmul.f32 0.6931472, %v1477_v40 }
 0x1c2   : > { %v1163_v56 = vadd.f32 %v1162_v51, %v1150_v16 }
 0x1c4   : > { %v1201_v61 = vsel %vm476_vm3, %v1163_v56, %v1199_v5 }
 0x1c5   : > { %v1203_v4 = vsel %vm1202_vm7, %v1201_v61, %v1185_v32 }
 0x1c6   : > { %1205 = vst.msk [vmem:[%s2103_s7] sm:$0x7] %vm1204_vm13, %v1203_v4 }
 0x1c7 PF: > { %s2122_s23 = sadd.s32 4294967295, %s1532_s11   ;;  %s1230_s26 = sshll.u32 %s2104_s8, 4  ;;  %s1231_s26 = int_to_ptr.hbm [resolvable:$true] %s1230_s26 }
 0x1c8   : > { %p1402_p7 = scmp.eq.s32.totalorder %s2122_s23, 7  ;;  %s1540_s27 = smov [#allocation6]  }
 0x1c9   : > { %s1228_s28 = sshll.u32 %s1540_s27, 4  ;;  %s1229_s28 = int_to_ptr.vmem [resolvable:$true] %s1228_s28 }
 0x1ca   : > { %1399 = dma.vmem_to_hbm [thread:$0]  (%p1402_p7), %s1229_s28, 16, %s1231_s26, [#allocation7]  }
 0x1cb   : > { %1519 = dma.done.wait (%p1402_p7), [#allocation7], 16  }
 0x1cc   : > { %1521 = vsyncadd (%p1402_p7), [#allocation7], 4294967280 }
 0x1cd PF: > { %s21_s11 = sadd.s32 1, %s1532_s11   ;;  %s2123_s30 = smov %s1528_s10 }
 0x1ce   : > { %p18_p8 = scmp.ge.s32.totalorder %s21_s11, 10   ;;  %s2124_s10 = smov %s2126_s13 }
 0x1d0   :  { %20 = sbr.rel (!%p18_p8) target bundleno = 2 (0x2), region = 117 }
 0x1d5   :  { %1264 = vsyncpa [#allocation7], 1 }
 0x1d6   :  { %1266 = vsyncpa [#allocation7 + $0x1], 1 }

</bundles_post_ra>
